<compile_context>
chip_gen: v5e
topology: v5e:2x2
jax: 0.10.0
libtpu: 0.0.40
codegen_flags: <defaults>
</compile_context>

<pallas_src>
import math

import jax
import jax.numpy as jnp
from jax.experimental import pallas as pl
from jax.experimental.pallas import tpu as pltpu

_EPS = 1e-5


def _proj_bn_kernel(x_ref, w3_ref, tpg_ref):
    """Fused theta/phi/gamma 1x1 conv + training-mode BatchNorm.

    x_ref:   (B, C, HW)   f32
    w3_ref:  (3P, C)      f32  -- [theta; phi; gamma] weights stacked on rows
    tpg_ref: (B, 3P, HW)  f32  -- BN-normalised projections
    """
    B, _, HW = x_ref.shape
    n_inv = 1.0 / (B * HW)
    w3 = w3_ref[...]

    # One fused MXU matmul per batch element: (3P, C) @ (C, HW) -> (3P, HW).
    ys = [jnp.dot(w3, x_ref[b], preferred_element_type=jnp.float32)
          for b in range(B)]

    # Single-pass batch statistics per output channel, reduced over the lane
    # (HW) axis and accumulated over the batch.  Conv biases are omitted: the
    # mean subtraction below cancels any per-channel constant exactly.
    s1 = ys[0].sum(axis=1, keepdims=True)
    s2 = (ys[0] * ys[0]).sum(axis=1, keepdims=True)
    for b in range(1, B):
        s1 = s1 + ys[b].sum(axis=1, keepdims=True)
        s2 = s2 + (ys[b] * ys[b]).sum(axis=1, keepdims=True)
    mean = s1 * n_inv
    var = s2 * n_inv - mean * mean
    inv_std = jax.lax.rsqrt(var + _EPS)

    for b in range(B):
        tpg_ref[b] = (ys[b] - mean) * inv_std


def _attention_kernel(tpg_ref, wo_ref, y_ref):
    """Per-batch-element global-softmax attention + omega 1x1 conv (pre-BN).

    tpg_ref: (3P, HW) f32  -- BN'd theta/phi/gamma of one batch element
    wo_ref:  (C, P)   f32  -- omega weight
    y_ref:   (C, HW)  f32  -- omega output before BatchNorm
    """
    P = wo_ref.shape[1]
    tpg = tpg_ref[...]
    t = tpg[0 * P:1 * P, :]          # (P, HW)
    p = tpg[1 * P:2 * P, :]          # (P, HW)
    g = tpg[2 * P:3 * P, :]          # (P, HW)

    # logits^T[k, q] = sum_c p[c, k] * t[c, q]; stored transposed so that all
    # downstream results stay spatial-on-lanes with no large transposes.
    logits_t = jax.lax.dot_general(
        p, t, (((0,), (0,)), ((), ())), preferred_element_type=jnp.float32)

    # Softmax over the ENTIRE flattened HW*HW map of this batch element
    # (matches softmax(attention.view(B, -1), dim=1)); invariant under the
    # transposed storage.  Normalisation is deferred past the matmuls.
    m = jnp.max(jnp.max(logits_t, axis=1, keepdims=True), axis=0, keepdims=True)
    e = jnp.exp(logits_t - m)                                              # (HW, HW)
    s = jnp.sum(jnp.sum(e, axis=1, keepdims=True), axis=0, keepdims=True)  # (1, 1)

    # sat^T[c, q] = sum_k g[c, k] * att[q, k]; K = HW, so bf16 MXU operands
    # pay off here (f32 accumulation via preferred_element_type).
    sat_t = jnp.dot(g.astype(jnp.bfloat16), e.astype(jnp.bfloat16),
                    preferred_element_type=jnp.float32)                    # (P, HW)

    # omega 1x1 conv (bias dropped: cancelled by the following BatchNorm) and
    # the deferred softmax normalisation applied to the small (C, HW) result.
    y = jnp.dot(wo_ref[...], sat_t, preferred_element_type=jnp.float32)
    y_ref[...] = y * pl.reciprocal(s, approx=True)
    # TODO(synk): for HW >~ 2k, tile the q axis with a two-pass global-softmax
    # carry so the HW*HW map never has to be fully VMEM-resident (v7x: 64 MiB).


def _bn_residual_kernel(x_ref, y_ref, out_ref):
    """omega BatchNorm (training-mode batch stats) + residual add.

    x_ref, y_ref, out_ref: (B, C, HW) f32
    """
    B, _, HW = x_ref.shape
    n_inv = 1.0 / (B * HW)
    ys = [y_ref[b] for b in range(B)]
    s1 = ys[0].sum(axis=1, keepdims=True)
    s2 = (ys[0] * ys[0]).sum(axis=1, keepdims=True)
    for b in range(1, B):
        s1 = s1 + ys[b].sum(axis=1, keepdims=True)
        s2 = s2 + (ys[b] * ys[b]).sum(axis=1, keepdims=True)
    mean = s1 * n_inv
    var = s2 * n_inv - mean * mean
    inv_std = jax.lax.rsqrt(var + _EPS)
    for b in range(B):
        out_ref[b] = x_ref[b] + (ys[b] - mean) * inv_std


@jax.jit
def self_attention_forward(x_nchw, params):
    B, C, H, W = x_nchw.shape
    HW = H * W
    P = params['theta_w'].shape[0]

    # Spatial-on-lanes layout (B, C, HW): a pure reshape, no transpose.
    x_flat = x_nchw.reshape(B, C, HW).astype(jnp.float32)

    # Fuse the three projection weights into one (3P, C) matrix.
    w3 = jnp.concatenate(
        [params['theta_w'], params['phi_w'], params['gamma_w']], axis=0
    ).astype(jnp.float32)
    wo = params['omega_w'].astype(jnp.float32)

    vmem = pl.BlockSpec(memory_space=pltpu.MemorySpace.VMEM)

    # Stage 1: fused projections + BatchNorm.  Batch statistics couple the
    # whole batch, so this stage is one un-gridded block (tiny tensors).
    tpg = pl.pallas_call(
        _proj_bn_kernel,
        out_shape=jax.ShapeDtypeStruct((B, 3 * P, HW), jnp.float32),
        in_specs=[vmem, vmem],
        out_specs=vmem,
    )(x_flat, w3)

    # Stage 2: attention + omega projection, gridded over the batch so blocks
    # pipeline and v7x's two TensorCores split the grid.
    y_pre = pl.pallas_call(
        _attention_kernel,
        out_shape=jax.ShapeDtypeStruct((B, C, HW), jnp.float32),
        grid=(B,),
        in_specs=[
            pl.BlockSpec((None, 3 * P, HW), lambda b: (b, 0, 0)),
            pl.BlockSpec((C, P), lambda b: (0, 0)),
        ],
        out_specs=pl.BlockSpec((None, C, HW), lambda b: (b, 0, 0)),
        compiler_params=pltpu.CompilerParams(
            dimension_semantics=("parallel",),
            vmem_limit_bytes=32 * 1024 * 1024,
        ),
    )(tpg, wo)

    # Stage 3: omega BatchNorm (whole-batch stats) + residual.
    out_flat = pl.pallas_call(
        _bn_residual_kernel,
        out_shape=jax.ShapeDtypeStruct((B, C, HW), jnp.float32),
        in_specs=[vmem, vmem],
        out_specs=vmem,
    )(x_flat, y_pre)

    return out_flat.reshape(B, C, H, W)


def reference(x, params):
    """Pure-JAX reference mirroring the PyTorch module (training-mode BN)."""
    B, C, H, W = x.shape
    HW = H * W

    def conv1x1(inp, w, b):
        y = jnp.einsum('oc,bchw->bohw', w, inp, precision='highest')
        return y + b[None, :, None, None]

    def bn(y):
        mean = jnp.mean(y, axis=(0, 2, 3), keepdims=True)
        var = jnp.mean((y - mean) ** 2, axis=(0, 2, 3), keepdims=True)
        return (y - mean) / jnp.sqrt(var + _EPS)

    t = bn(conv1x1(x, params['theta_w'], params['theta_b']))
    p = bn(conv1x1(x, params['phi_w'], params['phi_b']))
    g = bn(conv1x1(x, params['gamma_w'], params['gamma_b']))

    t2 = jnp.transpose(t.reshape(B, -1, HW), (0, 2, 1))       # (B, HW, P)
    p2 = p.reshape(B, -1, HW)                                 # (B, P, HW)
    att = jnp.einsum('bqc,bck->bqk', t2, p2, precision='highest')
    att = jax.nn.softmax(att.reshape(B, -1), axis=1).reshape(B, HW, HW)
    g2 = jnp.transpose(g.reshape(B, -1, HW), (0, 2, 1))       # (B, HW, P)
    sat = jnp.einsum('bqk,bkc->bqc', att, g2, precision='highest')
    sat = jnp.transpose(sat, (0, 2, 1)).reshape(B, -1, H, W)  # (B, P, H, W)
    y = bn(conv1x1(sat, params['omega_w'], params['omega_b']))
    return x + y


def init_params(key, inplanes, planes):
    kt, kp_, kg, ko = jax.random.split(key, 4)

    def conv_w(k, cout, cin):
        # kaiming_normal_(mode='fan_out', nonlinearity='relu') for a 1x1 conv:
        # std = sqrt(2 / fan_out), fan_out = out_channels.
        return jax.random.normal(k, (cout, cin), jnp.float32) * math.sqrt(2.0 / cout)

    return {
        'theta_w': conv_w(kt, planes, inplanes),
        'theta_b': jnp.zeros((planes,), jnp.float32),
        'phi_w':   conv_w(kp_, planes, inplanes),
        'phi_b':   jnp.zeros((planes,), jnp.float32),
        'gamma_w': conv_w(kg, planes, inplanes),
        'gamma_b': jnp.zeros((planes,), jnp.float32),
        'omega_w': conv_w(ko, inplanes, planes),
        'omega_b': jnp.zeros((inplanes,), jnp.float32),
    }


if __name__ == "__main__":
    inplanes, planes = 4, 4
    B, H, W = 2, 16, 16

    key = jax.random.PRNGKey(0)
    kx, kparams = jax.random.split(key)
    params = init_params(kparams, inplanes, planes)
    x = jax.random.normal(kx, (B, inplanes, H, W), jnp.float32)

    out = self_attention_forward(x, params)
    jax.block_until_ready(out)

    ref = reference(x, params)
    assert out.shape == x.shape
    max_err = jnp.max(jnp.abs(out - ref))
    # Tolerance accounts for bf16 MXU operands on the attention-weighted sum
    # and the approximate softmax-denominator reciprocal.
    assert jnp.allclose(out, ref, atol=2e-2, rtol=2e-2), (
        f"mismatch vs reference (max abs err {max_err})")
    print("KERNEL_OK")
</pallas_src>

<mosaic_0001>
module attributes {stable_mosaic.version = 11 : i64} {
  func.func @_attention_kernel(%arg0: i32, %arg1: memref<1x12x256xf32, #tpu.memory_space<vmem>>, %arg2: memref<4x4xf32, #tpu.memory_space<vmem>>, %arg3: memref<1x4x256xf32, #tpu.memory_space<vmem>>) attributes {dimension_semantics = [#tpu.dimension_semantics<parallel>], iteration_bounds = array<i64: 2>, scalar_prefetch = 0 : i64, scratch_operands = 0 : i64, tpu.core_type = #tpu.core_type<tc>, window_params = [{transform_indices = @transform_0, window_bounds = array<i64: 1, 12, 256>}, {pipeline_mode = #tpu.pipeline_mode<synchronous>, transform_indices = @transform_1, window_bounds = array<i64: 4, 4>}, {transform_indices = @transform_2, window_bounds = array<i64: 1, 4, 256>}]} {
    %c0 = arith.constant 0 : index
    %c0_0 = arith.constant 0 : index
    %c0_1 = arith.constant 0 : index
    %0 = vector.load %arg1[%c0, %c0_0, %c0_1] : memref<1x12x256xf32, #tpu.memory_space<vmem>>, vector<1x12x256xf32>
    %1 = vector.shape_cast %0 : vector<1x12x256xf32> to vector<12x256xf32>
    %2 = vector.extract_strided_slice %1 {offsets = [0, 0], sizes = [4, 256], strides = [1, 1]} : vector<12x256xf32> to vector<4x256xf32>
    %3 = vector.extract_strided_slice %1 {offsets = [4, 0], sizes = [4, 256], strides = [1, 1]} : vector<12x256xf32> to vector<4x256xf32>
    %4 = vector.extract_strided_slice %1 {offsets = [8, 0], sizes = [4, 256], strides = [1, 1]} : vector<12x256xf32> to vector<4x256xf32>
    %cst = arith.constant dense<0.000000e+00> : vector<256x256xf32>
    %5 = tpu.matmul %3, %2, %cst {dimension_numbers = #tpu.dot_dimension_numbers<[0], [0], [1], [1], [0, 1, 1, 1], [], []>} : vector<4x256xf32>, vector<4x256xf32>, vector<256x256xf32> -> vector<256x256xf32>
    %cst_2 = arith.constant dense<0xFF800000> : vector<256xf32>
    %6 = vector.multi_reduction <maximumf>, %5, %cst_2 [1] : vector<256x256xf32> to vector<256xf32>
    %7 = vector.shape_cast %6 : vector<256xf32> to vector<256x1xf32>
    %cst_3 = arith.constant dense<0xFF800000> : vector<1xf32>
    %8 = vector.multi_reduction <maximumf>, %7, %cst_3 [0] : vector<256x1xf32> to vector<1xf32>
    %9 = vector.shape_cast %8 : vector<1xf32> to vector<1x1xf32>
    %10 = vector.broadcast %9 : vector<1x1xf32> to vector<256x256xf32>
    %11 = arith.subf %5, %10 : vector<256x256xf32>
    %12 = math.exp %11 : vector<256x256xf32>
    %cst_4 = arith.constant dense<0.000000e+00> : vector<256xf32>
    %13 = vector.multi_reduction <add>, %12, %cst_4 [1] : vector<256x256xf32> to vector<256xf32>
    %14 = vector.shape_cast %13 : vector<256xf32> to vector<256x1xf32>
    %cst_5 = arith.constant dense<0.000000e+00> : vector<1xf32>
    %15 = vector.multi_reduction <add>, %14, %cst_5 [0] : vector<256x1xf32> to vector<1xf32>
    %16 = vector.shape_cast %15 : vector<1xf32> to vector<1x1xf32>
    %17 = arith.truncf %4 : vector<4x256xf32> to vector<4x256xbf16>
    %18 = arith.truncf %12 : vector<256x256xf32> to vector<256x256xbf16>
    %cst_6 = arith.constant dense<0.000000e+00> : vector<4x256xf32>
    %19 = tpu.matmul %17, %18, %cst_6 {dimension_numbers = #tpu.dot_dimension_numbers<[1], [0], [0], [1], [0, 0, 1, 1], [], []>} : vector<4x256xbf16>, vector<256x256xbf16>, vector<4x256xf32> -> vector<4x256xf32>
    %c0_7 = arith.constant 0 : index
    %c0_8 = arith.constant 0 : index
    %20 = vector.load %arg2[%c0_7, %c0_8] : memref<4x4xf32, #tpu.memory_space<vmem>>, vector<4x4xf32>
    %cst_9 = arith.constant dense<0.000000e+00> : vector<4x256xf32>
    %21 = tpu.matmul %20, %19, %cst_9 {dimension_numbers = #tpu.dot_dimension_numbers<[1], [0], [0], [1], [0, 0, 1, 1], [], []>} : vector<4x4xf32>, vector<4x256xf32>, vector<4x256xf32> -> vector<4x256xf32>
    %22 = tpu.reciprocal %16 {approx = true} : vector<1x1xf32> -> vector<1x1xf32>
    %23 = vector.broadcast %22 : vector<1x1xf32> to vector<4x256xf32>
    %24 = arith.mulf %21, %23 : vector<4x256xf32>
    %c0_10 = arith.constant 0 : index
    %c0_11 = arith.constant 0 : index
    %c0_12 = arith.constant 0 : index
    %25 = vector.load %arg3[%c0_10, %c0_11, %c0_12] : memref<1x4x256xf32, #tpu.memory_space<vmem>>, vector<1x4x256xf32>
    %26 = vector.shape_cast %25 : vector<1x4x256xf32> to vector<4x256xf32>
    %27 = vector.shape_cast %24 : vector<4x256xf32> to vector<1x4x256xf32>
    tpu.vector_store %arg3[%c0_10, %c0_11, %c0_12], %27 {strides = array<i32>} : memref<1x4x256xf32, #tpu.memory_space<vmem>>, vector<1x4x256xf32>,
    return
  }
  func.func @transform_0(%arg0: i32) -> (i32, i32, i32) {
    %c0_i32 = arith.constant 0 : i32
    %c0_i32_0 = arith.constant 0 : i32
    %c0_i32_1 = arith.constant 0 : i32
    return %arg0, %c0_i32, %c0_i32_0 : i32, i32, i32
  }
  func.func @transform_1(%arg0: i32) -> (i32, i32) {
    %c0_i32 = arith.constant 0 : i32
    %c0_i32_0 = arith.constant 0 : i32
    %c0_i32_1 = arith.constant 0 : i32
    return %c0_i32, %c0_i32_0 : i32, i32
  }
  func.func @transform_2(%arg0: i32) -> (i32, i32, i32) {
    %c0_i32 = arith.constant 0 : i32
    %c0_i32_0 = arith.constant 0 : i32
    %c0_i32_1 = arith.constant 0 : i32
    return %arg0, %c0_i32, %c0_i32_0 : i32, i32, i32
  }
}

module attributes {stable_mosaic.version = 11 : i64} {
  func.func @_proj_bn_kernel(%arg0: memref<2x4x256xf32, #tpu.memory_space<vmem>>, %arg1: memref<12x4xf32, #tpu.memory_space<vmem>>, %arg2: memref<2x12x256xf32, #tpu.memory_space<vmem>>) attributes {dimension_semantics = [], scalar_prefetch = 0 : i64, scratch_operands = 0 : i64, tpu.core_type = #tpu.core_type<tc>} {
    %c0 = arith.constant 0 : index
    %c0_0 = arith.constant 0 : index
    %0 = vector.load %arg1[%c0, %c0_0] : memref<12x4xf32, #tpu.memory_space<vmem>>, vector<12x4xf32>
    %c0_1 = arith.constant 0 : index
    %c0_2 = arith.constant 0 : index
    %c0_3 = arith.constant 0 : index
    %1 = vector.load %arg0[%c0_1, %c0_2, %c0_3] : memref<2x4x256xf32, #tpu.memory_space<vmem>>, vector<1x4x256xf32>
    %2 = vector.shape_cast %1 : vector<1x4x256xf32> to vector<4x256xf32>
    %cst = arith.constant dense<0.000000e+00> : vector<12x256xf32>
    %3 = tpu.matmul %0, %2, %cst {dimension_numbers = #tpu.dot_dimension_numbers<[1], [0], [0], [1], [0, 0, 1, 1], [], []>} : vector<12x4xf32>, vector<4x256xf32>, vector<12x256xf32> -> vector<12x256xf32>
    %c1 = arith.constant 1 : index
    %c0_4 = arith.constant 0 : index
    %c0_5 = arith.constant 0 : index
    %4 = vector.load %arg0[%c1, %c0_4, %c0_5] : memref<2x4x256xf32, #tpu.memory_space<vmem>>, vector<1x4x256xf32>
    %5 = vector.shape_cast %4 : vector<1x4x256xf32> to vector<4x256xf32>
    %cst_6 = arith.constant dense<0.000000e+00> : vector<12x256xf32>
    %6 = tpu.matmul %0, %5, %cst_6 {dimension_numbers = #tpu.dot_dimension_numbers<[1], [0], [0], [1], [0, 0, 1, 1], [], []>} : vector<12x4xf32>, vector<4x256xf32>, vector<12x256xf32> -> vector<12x256xf32>
    %cst_7 = arith.constant dense<0.000000e+00> : vector<12xf32>
    %7 = vector.multi_reduction <add>, %3, %cst_7 [1] : vector<12x256xf32> to vector<12xf32>
    %8 = vector.shape_cast %7 : vector<12xf32> to vector<12x1xf32>
    %9 = arith.mulf %3, %3 : vector<12x256xf32>
    %cst_8 = arith.constant dense<0.000000e+00> : vector<12xf32>
    %10 = vector.multi_reduction <add>, %9, %cst_8 [1] : vector<12x256xf32> to vector<12xf32>
    %11 = vector.shape_cast %10 : vector<12xf32> to vector<12x1xf32>
    %cst_9 = arith.constant dense<0.000000e+00> : vector<12xf32>
    %12 = vector.multi_reduction <add>, %6, %cst_9 [1] : vector<12x256xf32> to vector<12xf32>
    %13 = vector.shape_cast %12 : vector<12xf32> to vector<12x1xf32>
    %14 = arith.addf %8, %13 : vector<12x1xf32>
    %15 = arith.mulf %6, %6 : vector<12x256xf32>
    %cst_10 = arith.constant dense<0.000000e+00> : vector<12xf32>
    %16 = vector.multi_reduction <add>, %15, %cst_10 [1] : vector<12x256xf32> to vector<12xf32>
    %17 = vector.shape_cast %16 : vector<12xf32> to vector<12x1xf32>
    %18 = arith.addf %11, %17 : vector<12x1xf32>
    %cst_11 = arith.constant 0.001953125 : f32
    %19 = vector.broadcast %cst_11 : f32 to vector<12x1xf32>
    %20 = arith.mulf %14, %19 : vector<12x1xf32>
    %cst_12 = arith.constant 0.001953125 : f32
    %21 = vector.broadcast %cst_12 : f32 to vector<12x1xf32>
    %22 = arith.mulf %18, %21 : vector<12x1xf32>
    %23 = arith.mulf %20, %20 : vector<12x1xf32>
    %24 = arith.subf %22, %23 : vector<12x1xf32>
    %cst_13 = arith.constant 9.99999974E-6 : f32
    %25 = vector.broadcast %cst_13 : f32 to vector<12x1xf32>
    %26 = arith.addf %24, %25 : vector<12x1xf32>
    %27 = math.rsqrt %26 : vector<12x1xf32>
    %28 = vector.broadcast %20 : vector<12x1xf32> to vector<12x256xf32>
    %29 = arith.subf %3, %28 : vector<12x256xf32>
    %30 = vector.broadcast %27 : vector<12x1xf32> to vector<12x256xf32>
    %31 = arith.mulf %29, %30 : vector<12x256xf32>
    %c0_14 = arith.constant 0 : index
    %c0_15 = arith.constant 0 : index
    %c0_16 = arith.constant 0 : index
    %32 = vector.load %arg2[%c0_14, %c0_15, %c0_16] : memref<2x12x256xf32, #tpu.memory_space<vmem>>, vector<1x12x256xf32>
    %33 = vector.shape_cast %32 : vector<1x12x256xf32> to vector<12x256xf32>
    %34 = vector.shape_cast %31 : vector<12x256xf32> to vector<1x12x256xf32>
    tpu.vector_store %arg2[%c0_14, %c0_15, %c0_16], %34 {strides = array<i32>} : memref<2x12x256xf32, #tpu.memory_space<vmem>>, vector<1x12x256xf32>,
    %35 = vector.broadcast %20 : vector<12x1xf32> to vector<12x256xf32>
    %36 = arith.subf %6, %35 : vector<12x256xf32>
    %37 = vector.broadcast %27 : vector<12x1xf32> to vector<12x256xf32>
    %38 = arith.mulf %36, %37 : vector<12x256xf32>
    %c1_17 = arith.constant 1 : index
    %c0_18 = arith.constant 0 : index
    %c0_19 = arith.constant 0 : index
    %39 = vector.load %arg2[%c1_17, %c0_18, %c0_19] : memref<2x12x256xf32, #tpu.memory_space<vmem>>, vector<1x12x256xf32>
    %40 = vector.shape_cast %39 : vector<1x12x256xf32> to vector<12x256xf32>
    %41 = vector.shape_cast %38 : vector<12x256xf32> to vector<1x12x256xf32>
    tpu.vector_store %arg2[%c1_17, %c0_18, %c0_19], %41 {strides = array<i32>} : memref<2x12x256xf32, #tpu.memory_space<vmem>>, vector<1x12x256xf32>,
    return
  }
}

module attributes {stable_mosaic.version = 11 : i64} {
  func.func @_bn_residual_kernel(%arg0: memref<2x4x256xf32, #tpu.memory_space<vmem>>, %arg1: memref<2x4x256xf32, #tpu.memory_space<vmem>>, %arg2: memref<2x4x256xf32, #tpu.memory_space<vmem>>) attributes {dimension_semantics = [], scalar_prefetch = 0 : i64, scratch_operands = 0 : i64, tpu.core_type = #tpu.core_type<tc>} {
    %c0 = arith.constant 0 : index
    %c0_0 = arith.constant 0 : index
    %c0_1 = arith.constant 0 : index
    %0 = vector.load %arg1[%c0, %c0_0, %c0_1] : memref<2x4x256xf32, #tpu.memory_space<vmem>>, vector<1x4x256xf32>
    %1 = vector.shape_cast %0 : vector<1x4x256xf32> to vector<4x256xf32>
    %c1 = arith.constant 1 : index
    %c0_2 = arith.constant 0 : index
    %c0_3 = arith.constant 0 : index
    %2 = vector.load %arg1[%c1, %c0_2, %c0_3] : memref<2x4x256xf32, #tpu.memory_space<vmem>>, vector<1x4x256xf32>
    %3 = vector.shape_cast %2 : vector<1x4x256xf32> to vector<4x256xf32>
    %cst = arith.constant dense<0.000000e+00> : vector<4xf32>
    %4 = vector.multi_reduction <add>, %1, %cst [1] : vector<4x256xf32> to vector<4xf32>
    %5 = vector.shape_cast %4 : vector<4xf32> to vector<4x1xf32>
    %6 = arith.mulf %1, %1 : vector<4x256xf32>
    %cst_4 = arith.constant dense<0.000000e+00> : vector<4xf32>
    %7 = vector.multi_reduction <add>, %6, %cst_4 [1] : vector<4x256xf32> to vector<4xf32>
    %8 = vector.shape_cast %7 : vector<4xf32> to vector<4x1xf32>
    %cst_5 = arith.constant dense<0.000000e+00> : vector<4xf32>
    %9 = vector.multi_reduction <add>, %3, %cst_5 [1] : vector<4x256xf32> to vector<4xf32>
    %10 = vector.shape_cast %9 : vector<4xf32> to vector<4x1xf32>
    %11 = arith.addf %5, %10 : vector<4x1xf32>
    %12 = arith.mulf %3, %3 : vector<4x256xf32>
    %cst_6 = arith.constant dense<0.000000e+00> : vector<4xf32>
    %13 = vector.multi_reduction <add>, %12, %cst_6 [1] : vector<4x256xf32> to vector<4xf32>
    %14 = vector.shape_cast %13 : vector<4xf32> to vector<4x1xf32>
    %15 = arith.addf %8, %14 : vector<4x1xf32>
    %cst_7 = arith.constant 0.001953125 : f32
    %16 = vector.broadcast %cst_7 : f32 to vector<4x1xf32>
    %17 = arith.mulf %11, %16 : vector<4x1xf32>
    %cst_8 = arith.constant 0.001953125 : f32
    %18 = vector.broadcast %cst_8 : f32 to vector<4x1xf32>
    %19 = arith.mulf %15, %18 : vector<4x1xf32>
    %20 = arith.mulf %17, %17 : vector<4x1xf32>
    %21 = arith.subf %19, %20 : vector<4x1xf32>
    %cst_9 = arith.constant 9.99999974E-6 : f32
    %22 = vector.broadcast %cst_9 : f32 to vector<4x1xf32>
    %23 = arith.addf %21, %22 : vector<4x1xf32>
    %24 = math.rsqrt %23 : vector<4x1xf32>
    %c0_10 = arith.constant 0 : index
    %c0_11 = arith.constant 0 : index
    %c0_12 = arith.constant 0 : index
    %25 = vector.load %arg0[%c0_10, %c0_11, %c0_12] : memref<2x4x256xf32, #tpu.memory_space<vmem>>, vector<1x4x256xf32>
    %26 = vector.shape_cast %25 : vector<1x4x256xf32> to vector<4x256xf32>
    %27 = vector.broadcast %17 : vector<4x1xf32> to vector<4x256xf32>
    %28 = arith.subf %1, %27 : vector<4x256xf32>
    %29 = vector.broadcast %24 : vector<4x1xf32> to vector<4x256xf32>
    %30 = arith.mulf %28, %29 : vector<4x256xf32>
    %31 = arith.addf %26, %30 : vector<4x256xf32>
    %c0_13 = arith.constant 0 : index
    %c0_14 = arith.constant 0 : index
    %c0_15 = arith.constant 0 : index
    %32 = vector.load %arg2[%c0_13, %c0_14, %c0_15] : memref<2x4x256xf32, #tpu.memory_space<vmem>>, vector<1x4x256xf32>
    %33 = vector.shape_cast %32 : vector<1x4x256xf32> to vector<4x256xf32>
    %34 = vector.shape_cast %31 : vector<4x256xf32> to vector<1x4x256xf32>
    tpu.vector_store %arg2[%c0_13, %c0_14, %c0_15], %34 {strides = array<i32>} : memref<2x4x256xf32, #tpu.memory_space<vmem>>, vector<1x4x256xf32>,
    %c1_16 = arith.constant 1 : index
    %c0_17 = arith.constant 0 : index
    %c0_18 = arith.constant 0 : index
    %35 = vector.load %arg0[%c1_16, %c0_17, %c0_18] : memref<2x4x256xf32, #tpu.memory_space<vmem>>, vector<1x4x256xf32>
    %36 = vector.shape_cast %35 : vector<1x4x256xf32> to vector<4x256xf32>
    %37 = vector.broadcast %17 : vector<4x1xf32> to vector<4x256xf32>
    %38 = arith.subf %3, %37 : vector<4x256xf32>
    %39 = vector.broadcast %24 : vector<4x1xf32> to vector<4x256xf32>
    %40 = arith.mulf %38, %39 : vector<4x256xf32>
    %41 = arith.addf %36, %40 : vector<4x256xf32>
    %c1_19 = arith.constant 1 : index
    %c0_20 = arith.constant 0 : index
    %c0_21 = arith.constant 0 : index
    %42 = vector.load %arg2[%c1_19, %c0_20, %c0_21] : memref<2x4x256xf32, #tpu.memory_space<vmem>>, vector<1x4x256xf32>
    %43 = vector.shape_cast %42 : vector<1x4x256xf32> to vector<4x256xf32>
    %44 = vector.shape_cast %41 : vector<4x256xf32> to vector<1x4x256xf32>
    tpu.vector_store %arg2[%c1_19, %c0_20, %c0_21], %44 {strides = array<i32>} : memref<2x4x256xf32, #tpu.memory_space<vmem>>, vector<1x4x256xf32>,
    return
  }
}

</mosaic_0001>

<bundles_post_ra>
// kernel: self_attention_forward.5
= control target key start
LH: loop header
LB: loop body
LE: loop exit
PB: predicated region body
PF: predicated region fallthrough
CT: control target
= control target key end

     0   :  { %vm20_vm0 = vcmask 1043456   ;;  %v112_v36 = vmov 839922192   ;;  %s160_s1 = inlined_call_operand.vmem [shape: f32[2,4,256], index: 1, kind: input, shape index: {}]   ;;  %s161_s0 = inlined_call_operand.vmem [shape: f32[2,4,256], index: 0, kind: input, shape index: {}]   ;;  %s162_s2 = inlined_call_operand.vmem [shape: f32[2,4,256], index: 2, kind: output, shape index: {}]  }
   0x1   :  { %v131_v0 = vld [vmem:[%s160_s1] sm:$0xff]  ;;  %v106_v7 = vld [vmem:[%s160_s1 + $0x8] sm:$0xff]  ;;  %v81_v37 = vunpack.c.l.s4 %v112_v36 }
   0x2   :  { %15 = vst [vmem:[#allocation1] ss:$2 sm:$0xff] %v131_v0  ;;  %v26_v1 = vmul.f32 %v131_v0, %v131_v0  ;;  %v50_v13 = vmul.f32 %v106_v7, %v106_v7  ;;  %v78_v49 = vld [vmem:[%s161_s0] sm:$0xff]  ;;  %v107_v50 = vld [vmem:[%s161_s0 + $0x8] sm:$0xff] }
   0x3   :  { %v82_v40 = vunpack.c.0.s8 %v81_v37 }
   0x9   :  { %v16_v2 = vld.sshfl [vmem:[#allocation1] sm:$0xff pattern:$0x75316420]  ;;  %v17_v3 = vld.sshfl [vmem:[#allocation1 + $0x8] sm:$0xff pattern:$0x75316420] }
   0xa   :  { %v21_v4 = vsel %vm20_vm0, %v16_v2, 0.0  ;;  %v22_v5 = vsel %vm20_vm0, %v17_v3, 0.0  ;;  %28 = vst [vmem:[#allocation1] ss:$2 sm:$0xff] %v26_v1 }
   0xb   :  { %v23_v6 = vadd.f32 %v22_v5, %v21_v4 }
   0xd   :  { %24 = vadd.xlane.f32.xlu0 %v23_v6 }
  0x11   :  { %v29_v8 = vld.sshfl [vmem:[#allocation1] sm:$0xff pattern:$0x75316420]  ;;  %v30_v9 = vld.sshfl [vmem:[#allocation1 + $0x8] sm:$0xff pattern:$0x75316420] }
  0x12   :  { %v33_v10 = vsel %vm20_vm0, %v29_v8, 0.0  ;;  %v34_v11 = vsel %vm20_vm0, %v30_v9, 0.0  ;;  %39 = vst [vmem:[#allocation1] ss:$2 sm:$0xff] %v106_v7 }
  0x13   :  { %v35_v12 = vadd.f32 %v34_v11, %v33_v10 }
  0x15   :  { %36 = vadd.xlane.f32.xlu1 %v35_v12 }
  0x19   :  { %v40_v14 = vld.sshfl [vmem:[#allocation1] sm:$0xff pattern:$0x75316420]  ;;  %v41_v15 = vld.sshfl [vmem:[#allocation1 + $0x8] sm:$0xff pattern:$0x75316420] }
  0x1a   :  { %v44_v16 = vsel %vm20_vm0, %v40_v14, 0.0  ;;  %v45_v17 = vsel %vm20_vm0, %v41_v15, 0.0  ;;  %52 = vst [vmem:[#allocation1] ss:$2 sm:$0xff] %v50_v13 }
  0x1b   :  { %v46_v18 = vadd.f32 %v45_v17, %v44_v16 }
  0x1d   :  { %47 = vadd.xlane.f32.xlu0 %v46_v18 }
  0x21   :  { %v53_v19 = vld.sshfl [vmem:[#allocation1] sm:$0xff pattern:$0x75316420]  ;;  %v54_v20 = vld.sshfl [vmem:[#allocation1 + $0x8] sm:$0xff pattern:$0x75316420] }
  0x22   :  { %v57_v21 = vsel %vm20_vm0, %v53_v19, 0.0  ;;  %v58_v22 = vsel %vm20_vm0, %v54_v20, 0.0 }
  0x23   :  { %v59_v23 = vadd.f32 %v58_v22, %v57_v21 }
  0x25   :  { %60 = vadd.xlane.f32.xlu1 %v59_v23 }
  0x80   :  { %v25_v24 = vpop.xlane.xlu0 %24 }
  0x88   :  { %v37_v25 = vpop.xlane.xlu1 %36 }
  0x90   :  { %v48_v26 = vpop.xlane.xlu0 %47 }
  0x91   :  { %v49_v27 = vadd.f32 %v48_v26, %v25_v24 }
  0x93   :  { %v63_v28 = vmul.f32 0.001953125, %v49_v27 }
  0x95   :  { %v65_v31 = vmul.f32 %v63_v28, %v63_v28  ;;  %v83_v43 = vperm.slane %v63_v28, %v82_v40 }
  0x97   :  { %v85_v46 = vsub.f32 %v131_v0, %v83_v43  ;;  %v97_v47 = vsub.f32 %v106_v7, %v83_v43 }
  0x98   :  { %v61_v29 = vpop.xlane.xlu1 %60 }
  0x99   :  { %v62_v30 = vadd.f32 %v61_v29, %v37_v25 }
  0x9b   :  { %v64_v32 = vmul.f32 0.001953125, %v62_v30 }
  0x9d   :  { %v66_v33 = vsub.f32 %v64_v32, %v65_v31 }
  0x9f   :  { %v67_v34 = vadd.f32 1e-05, %v66_v33 }
  0xa1   :  { %110 = vrsqrt.f32 %v67_v34  ;;  %vm74_vm2 = vweird.f32 %v67_v34 }
  0xa7   :  { %v111_v35 = vpop.eup %110 }
  0xa8   :  { %v69_v38 = vmul.f32 %v111_v35, %v67_v34  ;;  %vm75_vm1 = vweird.f32 %v111_v35 }
  0xa9   :  { %vm76_vm3 = vmor %vm74_vm2, %vm75_vm1 }
  0xaa   :  { %v70_v39 = vmul.f32 %v111_v35, %v69_v38 }
  0xac   :  { %v71_v41 = vmul.f32 0.5, %v70_v39 }
  0xae   :  { %v72_v42 = vsub.f32 1.5, %v71_v41 }
  0xb0   :  { %v73_v44 = vmul.f32 %v111_v35, %v72_v42 }
  0xb2   :  { %v77_v45 = vsel %vm76_vm3, %v111_v35, %v73_v44 }
  0xb3   :  { %v90_v48 = vperm.slane %v77_v45, %v82_v40 }
  0xb5   :  { %v92_v51 = vmul.f32 %v90_v48, %v85_v46  ;;  %v98_v52 = vmul.f32 %v97_v47, %v90_v48 }
  0xb7   :  { %v93_v53 = vadd.f32 %v92_v51, %v78_v49  ;;  %v99_v54 = vadd.f32 %v107_v50, %v98_v52 }
  0xb9   :  { %94 = vst [vmem:[%s162_s2] sm:$0xff] %v93_v53 }
  0xba   :  { %108 = vst [vmem:[%s162_s2 + $0x8] sm:$0xff] %v99_v54 }

// kernel: self_attention_forward.3
= control target key start
LH: loop header
LB: loop body
LE: loop exit
PB: predicated region body
PF: predicated region fallthrough
CT: control target
= control target key end

     0   :  { %vm25_vm0 = vcmask 1043456   ;;  %vm18_vm1 = vcmask 31744   ;;  %s363_s0 = inlined_call_operand.vmem [shape: f32[2,4,256], index: 0, kind: input, shape index: {}]   ;;  %s364_s1 = inlined_call_operand.vmem [shape: f32[12,4], index: 1, kind: input, shape index: {}]   ;;  %s365_s2 = inlined_call_operand.vmem [shape: f32[2,12,256], index: 2, kind: output, shape index: {}]  }
   0x1   :  { %v13_v0 = vld [vmem:[%s363_s0] sm:$0xff]  ;;  %v241_v1 = vld [vmem:[%s363_s0 + $0x8] sm:$0xff] }
   0x2   :  { %15 = vst [vmem:[#allocation1] ss:$2 sm:$0xff] %v13_v0  ;;  %v11_v2 = vld [vmem:[%s364_s1] sm:$0xff]  ;;  %v12_v5 = vld [vmem:[%s364_s1 + $0x8] sm:$0xf] }
   0x9   :  { %v16_v3 = vld.sshfl [vmem:[#allocation1] sm:$0xff pattern:$0x75316420]  ;;  %v17_v4 = vld.sshfl [vmem:[#allocation1 + $0x8] sm:$0xff pattern:$0x75316420] }
   0xa   :  { %235 = vmatpush.msk.msra.mxu0 %vm25_vm0, %v16_v3  ;;  %238 = vmatpush.msk.msra.mxu1 %vm25_vm0, %v17_v4  ;;  %79 = vst [vmem:[#allocation1] ss:$2 sm:$0xff] %v241_v1 }
   0xb   :  { %236 = vmatmul.msk.f32.vlgmr.msra.gmra.mxu0 %vm18_vm1, %v11_v2  ;;  %239 = vmatmul.msk.f32.vlgmr.msra.gmra.mxu1 %vm18_vm1, %v11_v2 }
  0x11   :  { %v80_v6 = vld.sshfl [vmem:[#allocation1] sm:$0xff pattern:$0x75316420]  ;;  %v81_v7 = vld.sshfl [vmem:[#allocation1 + $0x8] sm:$0xff pattern:$0x75316420] }
  0x12   :  { %242 = vmatpush.msk.msra.mxu2 %vm25_vm0, %v80_v6  ;;  %245 = vmatpush.msk.msra.mxu3 %vm25_vm0, %v81_v7 }
  0x13   :  { %237 = vmatmul.msk.f32.gmra.mxu0 %vm18_vm1, %v12_v5  ;;  %240 = vmatmul.msk.f32.gmra.mxu1 %vm18_vm1, %v12_v5 }
  0x14   :  { %243 = vmatmul.msk.f32.vlgmr.msra.gmra.mxu2 %vm18_vm1, %v11_v2  ;;  %246 = vmatmul.msk.f32.vlgmr.msra.gmra.mxu3 %vm18_vm1, %v11_v2 }
  0x1c   :  { %244 = vmatmul.msk.f32.gmra.mxu2 %vm18_vm1, %v12_v5  ;;  %247 = vmatmul.msk.f32.gmra.mxu3 %vm18_vm1, %v12_v5 }
  0x88   :  { %v295_v8 = vpop.f32.mrf.mxu0  ;;  %v297_v9 = vpop.f32.mrf.mxu1 }
  0x89   :  { %v132_v10 = vadd.f32 %v297_v9, %v295_v8  ;;  %v140_v11 = vmul.f32 %v295_v8, %v295_v8  ;;  %v141_v12 = vmul.f32 %v297_v9, %v297_v9 }
  0x8b   :  { %133 = vadd.xlane.f32.xlu0 %v132_v10  ;;  %v144_v13 = vadd.f32 %v141_v12, %v140_v11 }
  0x8d   :  { %145 = vadd.xlane.f32.xlu2 %v144_v13 }
  0x90   :  { %v305_v14 = vpop.f32.mrf.mxu0  ;;  %v307_v15 = vpop.f32.mrf.mxu1 }
  0x91   :  { %v135_v16 = vsel %vm25_vm0, %v305_v14, 0.0  ;;  %v142_v17 = vmul.f32 %v305_v14, %v305_v14  ;;  %v136_v18 = vsel %vm25_vm0, %v307_v15, 0.0  ;;  %v143_v19 = vmul.f32 %v307_v15, %v307_v15 }
  0x92   :  { %v137_v20 = vadd.f32 %v136_v18, %v135_v16 }
  0x93   :  { %v147_v21 = vsel %vm25_vm0, %v142_v17, 0.0  ;;  %v148_v22 = vsel %vm25_vm0, %v143_v19, 0.0 }
  0x94   :  { %138 = vadd.xlane.f32.xlu0 %v137_v20  ;;  %v149_v23 = vadd.f32 %v148_v22, %v147_v21 }
  0x96   :  { %150 = vadd.xlane.f32.xlu2 %v149_v23 }
  0x97   :  { %v103_v24 = vpop.f32.mrf.mxu2  ;;  %v126_v25 = vpop.f32.mrf.mxu3 }
  0x98   :  { %v152_v26 = vadd.f32 %v126_v25, %v103_v24  ;;  %v162_v27 = vmul.f32 %v103_v24, %v103_v24  ;;  %v163_v28 = vmul.f32 %v126_v25, %v126_v25 }
  0x9a   :  { %153 = vadd.xlane.f32.xlu1 %v152_v26  ;;  %v166_v29 = vadd.f32 %v163_v28, %v162_v27 }
  0x9c   :  { %167 = vadd.xlane.f32.xlu0 %v166_v29 }
  0x9f   :  { %v319_v30 = vpop.f32.mrf.mxu2  ;;  %v321_v31 = vpop.f32.mrf.mxu3 }
  0xa0   :  { %v155_v32 = vsel %vm25_vm0, %v319_v30, 0.0  ;;  %v156_v33 = vsel %vm25_vm0, %v321_v31, 0.0  ;;  %v164_v35 = vmul.f32 %v319_v30, %v319_v30  ;;  %v165_v36 = vmul.f32 %v321_v31, %v321_v31 }
  0xa1   :  { %v157_v34 = vadd.f32 %v156_v33, %v155_v32 }
  0xa2   :  { %v169_v37 = vsel %vm25_vm0, %v164_v35, 0.0  ;;  %v170_v38 = vsel %vm25_vm0, %v165_v36, 0.0 }
  0xa3   :  { %158 = vadd.xlane.f32.xlu1 %v157_v34  ;;  %v171_v39 = vadd.f32 %v170_v38, %v169_v37 }
  0xab   :  { %172 = vadd.xlane.f32.xlu1 %v171_v39 }
  0xfe   :  { %v134_v40 = vpop.xlane.xlu0 %133 }
 0x100   :  { %v146_v43 = vpop.xlane.xlu2 %145 }
 0x107   :  { %v139_v41 = vpop.xlane.xlu0 %138 }
 0x109   :  { %v151_v55 = vpop.xlane.xlu2 %150 }
 0x10d   :  { %v154_v42 = vpop.xlane.xlu1 %153 }
 0x10e   :  { %v160_v44 = vadd.f32 %v154_v42, %v134_v40 }
 0x10f   :  { %v168_v45 = vpop.xlane.xlu0 %167 }
 0x110   :  { %v176_v46 = vmul.f32 0.001953125, %v160_v44  ;;  %v174_v47 = vadd.f32 %v168_v45, %v146_v43 }
 0x112   :  { %v180_v48 = vmul.f32 %v176_v46, %v176_v46  ;;  %v178_v49 = vmul.f32 0.001953125, %v174_v47  ;;  %v206_v4 = vsub.f32 %v295_v8, %v176_v46  ;;  %v207_v5 = vsub.f32 %v297_v9, %v176_v46 }
 0x113   :  { %v218_v6 = vsub.f32 %v103_v24, %v176_v46  ;;  %v219_v7 = vsub.f32 %v126_v25, %v176_v46 }
 0x114   :  { %v182_v50 = vsub.f32 %v178_v49, %v180_v48 }
 0x116   :  { %v159_v51 = vpop.xlane.xlu1 %158  ;;  %v184_v52 = vadd.f32 1e-05, %v182_v50 }
 0x117   :  { %v161_v53 = vadd.f32 %v159_v51, %v139_v41 }
 0x118   :  { %252 = vrsqrt.f32 %v184_v52  ;;  %vm192_vm3 = vweird.f32 %v184_v52 }
 0x119   :  { %v177_v54 = vmul.f32 0.001953125, %v161_v53 }
 0x11b   :  { %v181_v61 = vmul.f32 %v177_v54, %v177_v54  ;;  %v208_v21 = vsub.f32 %v305_v14, %v177_v54  ;;  %v209_v22 = vsub.f32 %v307_v15, %v177_v54  ;;  %v220_v23 = vsub.f32 %v319_v30, %v177_v54 }
 0x11c   :  { %v221_v24 = vsub.f32 %v321_v31, %v177_v54 }
 0x11e   :  { %v173_v56 = vpop.xlane.xlu1 %172  ;;  %v253_v57 = vpop.eup %252 }
 0x11f   :  { %v175_v58 = vadd.f32 %v173_v56, %v151_v55  ;;  %v187_v59 = vmul.f32 %v253_v57, %v184_v52  ;;  %vm193_vm2 = vweird.f32 %v253_v57 }
 0x120   :  { %vm194_vm4 = vmor %vm192_vm3, %vm193_vm2 }
 0x121   :  { %v179_v60 = vmul.f32 0.001953125, %v175_v58  ;;  %v188_v62 = vmul.f32 %v253_v57, %v187_v59 }
 0x123   :  { %v183_v63 = vsub.f32 %v179_v60, %v181_v61  ;;  %v189_v0 = vmul.f32 0.5, %v188_v62 }
 0x125   :  { %v185_v1 = vadd.f32 1e-05, %v183_v63  ;;  %v190_v2 = vsub.f32 1.5, %v189_v0 }
 0x127   :  { %254 = vrsqrt.f32 %v185_v1  ;;  %v191_v3 = vmul.f32 %v253_v57, %v190_v2  ;;  %vm202_vm6 = vweird.f32 %v185_v1 }
 0x129   :  { %v195_v10 = vsel %vm194_vm4, %v253_v57, %v191_v3 }
 0x12a   :  { %v210_v11 = vmul.f32 %v206_v4, %v195_v10  ;;  %v211_v12 = vmul.f32 %v207_v5, %v195_v10  ;;  %v222_v13 = vmul.f32 %v218_v6, %v195_v10  ;;  %v223_v16 = vmul.f32 %v219_v7, %v195_v10 }
 0x12c   :  { %214 = vst [vmem:[%s365_s2] sm:$0xff] %v210_v11 }
 0x12d   :  { %v255_v17 = vpop.eup %254  ;;  %215 = vst [vmem:[%s365_s2 + $0x8] sm:$0xff] %v211_v12 }
 0x12e   :  { %v197_v8 = vmul.f32 %v255_v17, %v185_v1  ;;  %248 = vst [vmem:[%s365_s2 + $0x20] sm:$0xff] %v222_v13  ;;  %vm203_vm5 = vweird.f32 %v255_v17 }
 0x12f   :  { %249 = vst [vmem:[%s365_s2 + $0x28] sm:$0xff] %v223_v16  ;;  %vm204_vm7 = vmor %vm202_vm6, %vm203_vm5 }
 0x130   :  { %v198_v9 = vmul.f32 %v255_v17, %v197_v8 }
 0x132   :  { %v199_v18 = vmul.f32 0.5, %v198_v9 }
 0x134   :  { %v200_v19 = vsub.f32 1.5, %v199_v18 }
 0x136   :  { %v201_v20 = vmul.f32 %v255_v17, %v200_v19 }
 0x138   :  { %v205_v25 = vsel %vm204_vm7, %v255_v17, %v201_v20 }
 0x139   :  { %v212_v26 = vmul.f32 %v208_v21, %v205_v25  ;;  %v213_v27 = vmul.f32 %v209_v22, %v205_v25  ;;  %v224_v28 = vmul.f32 %v220_v23, %v205_v25  ;;  %v225_v29 = vmul.f32 %v221_v24, %v205_v25 }
 0x13b   :  { %216 = vst [vmem:[%s365_s2 + $0x10] sm:$0xf] %v212_v26 }
 0x13c   :  { %217 = vst [vmem:[%s365_s2 + $0x18] sm:$0xf] %v213_v27 }
 0x13d   :  { %250 = vst [vmem:[%s365_s2 + $0x30] sm:$0xf] %v224_v28 }
 0x13e   :  { %251 = vst [vmem:[%s365_s2 + $0x38] sm:$0xf] %v225_v29 }

// kernel: self_attention_forward.4
= control target key start
LH: loop header
LB: loop body
LE: loop exit
PB: predicated region body
PF: predicated region fallthrough
CT: control target
= control target key end

     0   :  { %s1451_s9 = smov 0   ;;  %s2159_s0 = inlined_call_operand.vmem [shape: f32[2,12,256], index: 0, kind: input, shape index: {}]   ;;  %s2160_s1 = inlined_call_operand.vmem [shape: f32[4,4], index: 1, kind: input, shape index: {}]   ;;  %s2161_s2 = inlined_call_operand.vmem [shape: f32[2,4,256], index: 2, kind: output, shape index: {}]  }
   0x1 LB: > { %s1204_s10 = sadd.s32 4294967295, %s1434_s9   ;;  %p1208_p0 = scmp.ge.s32.totalorder %s1434_s9, 1  ;;  %s1434_s9 = sphi %s1451_s9, %s12_s9  }
   0x2   : > { %p112_p1 = scmp.lt.s32.totalorder %s1434_s9, 3 }
   0x4   : > { %p113_p2 = pnand %p1208_p0, %p112_p1 }
   0x6   : > { %116 = sbr.rel (%p113_p2) target bundleno = 1126 (0x466), region = 28 }
   0xb   : > { %p134_p3 = scmp.lt.s32.totalorder %s1204_s10, 1  ;;  %vm315_vm0 = vcmask 1043456   ;;  %vm218_vm1 = vcmask 31744  }
   0xd   : > { %s2331_s10 = smov (!%p134_p3, %s1204_s10), 1 }
   0xe   : > { %s1285_s11 = sshll.u32 %s2331_s10, 5  ;;  %s1286_s17 = sshll.u32 %s2331_s10, 3 }
   0xf   : > { %s1465_s14 = scalar_lea.vmem %s2159_s0, %s1285_s11  ;;  %s143_s20 = scalar_lea.vmem %s2161_s2, %s1286_s17 }
  0x10   : > { %v144_v0 = vld [vmem:[%s1465_s14] sm:$0xff]  ;;  %v145_v2 = vld [vmem:[%s1465_s14 + $0x8] sm:$0xff] }
  0x11   : > { %v150_v1 = vrot.slane %v144_v0, 4  ;;  %1213 = vmatpush.msk.msra.mxu0 %vm315_vm0, %v144_v0  ;;  %1246 = vmatpush.msk.msra.mxu1 %vm315_vm0, %v145_v2  ;;  %v151_v3 = vrot.slane %v145_v2, 4 }
  0x12   : > { %1288 = vmatpush.msk.msra.mxu3 %vm315_vm0, %v145_v2  ;;  %1287 = vmatpush.msk.msra.mxu2 %vm315_vm0, %v144_v0 }
  0x13   : > { %154 = vxpose.xlu0.b32.start.end [1/1] (short) %v150_v1, 128 }
  0x93   : > { %186 = vxpose.xlu0.b32.start.end [1/1] (short) %v151_v3, 128 }
  0xb7   : > { %v170_v4 = vpop.trf.xlu0 }
  0xb8   : > { %1214 = vmatmul.msk.f32.vlgmr.msra.gmra.mxu0 %vm218_vm1, %v170_v4  ;;  %1247 = vmatmul.msk.f32.vlgmr.msra.gmra.mxu1 %vm218_vm1, %v170_v4 }
  0xbf   : > { %v171_v5 = vpop.trf.xlu0 }
  0xc0   : > { %1215 = vmatmul.msk.f32.gmra.mxu0 %vm218_vm1, %v171_v5  ;;  %1248 = vmatmul.msk.f32.gmra.mxu1 %vm218_vm1, %v171_v5 }
  0xc7   : > { %v172_v6 = vpop.trf.xlu0 }
  0xc8   : > { %1216 = vmatmul.msk.f32.gmra.mxu0 %vm218_vm1, %v172_v6  ;;  %1249 = vmatmul.msk.f32.gmra.mxu1 %vm218_vm1, %v172_v6 }
  0xcf   : > { %v173_v7 = vpop.trf.xlu0 }
  0xd0   : > { %1217 = vmatmul.msk.f32.gmra.mxu0 %vm218_vm1, %v173_v7  ;;  %1250 = vmatmul.msk.f32.gmra.mxu1 %vm218_vm1, %v173_v7 }
  0xd7   : > { %v174_v8 = vpop.trf.xlu0 }
  0xd8   : > { %1218 = vmatmul.msk.f32.gmra.mxu0 %vm218_vm1, %v174_v8  ;;  %1251 = vmatmul.msk.f32.gmra.mxu1 %vm218_vm1, %v174_v8 }
  0xdf   : > { %v175_v9 = vpop.trf.xlu0 }
  0xe0   : > { %1219 = vmatmul.msk.f32.gmra.mxu0 %vm218_vm1, %v175_v9  ;;  %1252 = vmatmul.msk.f32.gmra.mxu1 %vm218_vm1, %v175_v9 }
  0xe7   : > { %v176_v10 = vpop.trf.xlu0 }
  0xe8   : > { %1220 = vmatmul.msk.f32.gmra.mxu0 %vm218_vm1, %v176_v10  ;;  %1253 = vmatmul.msk.f32.gmra.mxu1 %vm218_vm1, %v176_v10 }
  0xef   : > { %v177_v11 = vpop.trf.xlu0 }
  0xf0   : > { %1221 = vmatmul.msk.f32.gmra.mxu0 %vm218_vm1, %v177_v11  ;;  %1254 = vmatmul.msk.f32.gmra.mxu1 %vm218_vm1, %v177_v11 }
  0xf7   : > { %v178_v12 = vpop.trf.xlu0 }
  0xf8   : > { %1222 = vmatmul.msk.f32.gmra.mxu0 %vm218_vm1, %v178_v12  ;;  %1255 = vmatmul.msk.f32.gmra.mxu1 %vm218_vm1, %v178_v12 }
  0xff   : > { %v179_v13 = vpop.trf.xlu0 }
 0x100   : > { %1223 = vmatmul.msk.f32.gmra.mxu0 %vm218_vm1, %v179_v13  ;;  %1256 = vmatmul.msk.f32.gmra.mxu1 %vm218_vm1, %v179_v13 }
 0x107   : > { %v180_v14 = vpop.trf.xlu0 }
 0x108   : > { %1224 = vmatmul.msk.f32.gmra.mxu0 %vm218_vm1, %v180_v14  ;;  %1257 = vmatmul.msk.f32.gmra.mxu1 %vm218_vm1, %v180_v14 }
 0x10f   : > { %v181_v15 = vpop.trf.xlu0 }
 0x110   : > { %1225 = vmatmul.msk.f32.gmra.mxu0 %vm218_vm1, %v181_v15  ;;  %1258 = vmatmul.msk.f32.gmra.mxu1 %vm218_vm1, %v181_v15 }
 0x117   : > { %v182_v16 = vpop.trf.xlu0 }
 0x118   : > { %1226 = vmatmul.msk.f32.gmra.mxu0 %vm218_vm1, %v182_v16  ;;  %1259 = vmatmul.msk.f32.gmra.mxu1 %vm218_vm1, %v182_v16 }
 0x11f   : > { %v183_v17 = vpop.trf.xlu0 }
 0x120   : > { %1227 = vmatmul.msk.f32.gmra.mxu0 %vm218_vm1, %v183_v17  ;;  %1260 = vmatmul.msk.f32.gmra.mxu1 %vm218_vm1, %v183_v17 }
 0x127   : > { %v184_v18 = vpop.trf.xlu0 }
 0x128   : > { %1228 = vmatmul.msk.f32.gmra.mxu0 %vm218_vm1, %v184_v18  ;;  %1261 = vmatmul.msk.f32.gmra.mxu1 %vm218_vm1, %v184_v18 }
 0x12f   : > { %v185_v19 = vpop.trf.xlu0 }
 0x130   : > { %1229 = vmatmul.msk.f32.gmra.mxu0 %vm218_vm1, %v185_v19  ;;  %1262 = vmatmul.msk.f32.gmra.mxu1 %vm218_vm1, %v185_v19 }
 0x135   : > { %v1505_v20 = vpop.f32.mrf.mxu0  ;;  %v1507_v21 = vpop.f32.mrf.mxu1 }
 0x136   : > { %v546_v22 = vmax.f32 %v1505_v20, %v1507_v21 }
 0x137   : > { %v202_v23 = vpop.trf.xlu0 }
 0x138   : > { %547 = vmax.xlane.f32.xlu1 %v546_v22  ;;  %1230 = vmatmul.msk.f32.gmra.mxu0 %vm218_vm1, %v202_v23 }
 0x139   : > { %1263 = vmatmul.msk.f32.gmra.mxu1 %vm218_vm1, %v202_v23 }
 0x13d   : > { %v1513_v24 = vpop.f32.mrf.mxu0  ;;  %v1515_v25 = vpop.f32.mrf.mxu1 }
 0x13e   : > { %v549_v26 = vmax.f32 %v1513_v24, %v1515_v25 }
 0x13f   : > { %v203_v27 = vpop.trf.xlu0 }
 0x140   : > { %550 = vmax.xlane.f32.xlu1 %v549_v26  ;;  %1231 = vmatmul.msk.f32.gmra.mxu0 %vm218_vm1, %v203_v27 }
 0x141   : > { %1264 = vmatmul.msk.f32.gmra.mxu1 %vm218_vm1, %v203_v27 }
 0x145   : > { %v1521_v28 = vpop.f32.mrf.mxu0  ;;  %v1523_v29 = vpop.f32.mrf.mxu1 }
 0x146   : > { %v552_v30 = vmax.f32 %v1521_v28, %v1523_v29 }
 0x147   : > { %v204_v31 = vpop.trf.xlu0 }
 0x148   : > { %553 = vmax.xlane.f32.xlu2 %v552_v30  ;;  %1232 = vmatmul.msk.f32.gmra.mxu0 %vm218_vm1, %v204_v31 }
 0x149   : > { %1265 = vmatmul.msk.f32.gmra.mxu1 %vm218_vm1, %v204_v31 }
 0x14d   : > { %v1529_v32 = vpop.f32.mrf.mxu0  ;;  %v1531_v33 = vpop.f32.mrf.mxu1 }
 0x14e   : > { %v555_v34 = vmax.f32 %v1529_v32, %v1531_v33 }
 0x14f   : > { %v205_v35 = vpop.trf.xlu0 }
 0x150   : > { %556 = vmax.xlane.f32.xlu2 %v555_v34  ;;  %1233 = vmatmul.msk.f32.gmra.mxu0 %vm218_vm1, %v205_v35 }
 0x151   : > { %1266 = vmatmul.msk.f32.gmra.mxu1 %vm218_vm1, %v205_v35 }
 0x155   : > { %v1537_v36 = vpop.f32.mrf.mxu0  ;;  %v1539_v37 = vpop.f32.mrf.mxu1 }
 0x156   : > { %v558_v38 = vmax.f32 %v1537_v36, %v1539_v37 }
 0x157   : > { %v206_v39 = vpop.trf.xlu0 }
 0x158   : > { %559 = vmax.xlane.f32.xlu1 %v558_v38  ;;  %1234 = vmatmul.msk.f32.gmra.mxu0 %vm218_vm1, %v206_v39 }
 0x159   : > { %1267 = vmatmul.msk.f32.vlgmr.msra.gmra.mxu3 %vm218_vm1, %v206_v39 }
 0x15d   : > { %v1545_v40 = vpop.f32.mrf.mxu0  ;;  %v1547_v41 = vpop.f32.mrf.mxu1 }
 0x15e   : > { %v561_v42 = vmax.f32 %v1545_v40, %v1547_v41 }
 0x15f   : > { %v207_v43 = vpop.trf.xlu0 }
 0x160   : > { %562 = vmax.xlane.f32.xlu2 %v561_v42  ;;  %1235 = vmatmul.msk.f32.vlgmr.msra.gmra.mxu2 %vm218_vm1, %v207_v43 }
 0x161   : > { %1268 = vmatmul.msk.f32.gmra.mxu3 %vm218_vm1, %v207_v43 }
 0x165   : > { %v1553_v44 = vpop.f32.mrf.mxu0  ;;  %v1555_v45 = vpop.f32.mrf.mxu1 }
 0x166   : > { %v564_v46 = vmax.f32 %v1553_v44, %v1555_v45 }
 0x167   : > { %v208_v47 = vpop.trf.xlu0 }
 0x168   : > { %565 = vmax.xlane.f32.xlu1 %v564_v46  ;;  %1236 = vmatmul.msk.f32.gmra.mxu2 %vm218_vm1, %v208_v47 }
 0x169   : > { %1269 = vmatmul.msk.f32.gmra.mxu3 %vm218_vm1, %v208_v47 }
 0x16d   : > { %v1581_v58 = vpop.f32.mrf.mxu0  ;;  %v1583_v59 = vpop.f32.mrf.mxu1 }
 0x16e   : > { %v567_v14 = vmax.f32 %v1581_v58, %v1583_v59 }
 0x16f   : > { %v209_v48 = vpop.trf.xlu0 }
 0x170   : > { %1237 = vmatmul.msk.f32.gmra.mxu2 %vm218_vm1, %v209_v48 }
 0x171   : > { %1270 = vmatmul.msk.f32.gmra.mxu3 %vm218_vm1, %v209_v48 }
 0x175   : > { %v1587_v61 = vpop.f32.mrf.mxu0  ;;  %v1591_v63 = vpop.f32.mrf.mxu1 }
 0x176   : > { %v570_v19 = vmax.f32 %v1587_v61, %v1591_v63 }
 0x177   : > { %v210_v49 = vpop.trf.xlu0 }
 0x178   : > { %1238 = vmatmul.msk.f32.gmra.mxu2 %vm218_vm1, %v210_v49 }
 0x179   : > { %1271 = vmatmul.msk.f32.gmra.mxu3 %vm218_vm1, %v210_v49 }
 0x17d   : > { %v1595_v1 = vpop.f32.mrf.mxu0  ;;  %v1597_v2 = vpop.f32.mrf.mxu1 }
 0x17e   : > { %v573_v30 = vmax.f32 %v1595_v1, %v1597_v2 }
 0x17f   : > { %v211_v50 = vpop.trf.xlu0 }
 0x180   : > { %1239 = vmatmul.msk.f32.gmra.mxu2 %vm218_vm1, %v211_v50 }
 0x181   : > { %1272 = vmatmul.msk.f32.gmra.mxu3 %vm218_vm1, %v211_v50 }
 0x185   : > { %v1599_v3 = vpop.f32.mrf.mxu0  ;;  %v1603_v5 = vpop.f32.mrf.mxu1 }
 0x186   : > { %2214 = vst [vmem:[#allocation2_spill] sm:$0xff] %v1599_v3  ;;  %v576_v42 = vmax.f32 %v1599_v3, %v1603_v5 }
 0x187   : > { %v212_v51 = vpop.trf.xlu0  ;;  %2216 = vst [vmem:[#allocation4_spill] sm:$0xff] %v1603_v5 }
 0x188   : > { %1240 = vmatmul.msk.f32.gmra.mxu2 %vm218_vm1, %v212_v51 }
 0x189   : > { %1273 = vmatmul.msk.f32.gmra.mxu3 %vm218_vm1, %v212_v51 }
 0x18d   : > { %v1605_v6 = vpop.f32.mrf.mxu0  ;;  %v1613_v10 = vpop.f32.mrf.mxu1 }
 0x18e   : > { %2217 = vst [vmem:[#allocation5_spill] sm:$0xff] %v1605_v6  ;;  %v579_v50 = vmax.f32 %v1605_v6, %v1613_v10 }
 0x18f   : > { %v213_v52 = vpop.trf.xlu0  ;;  %2220 = vst [vmem:[#allocation8_spill] sm:$0xff] %v1613_v10 }
 0x190   : > { %1241 = vmatmul.msk.f32.gmra.mxu2 %vm218_vm1, %v213_v52 }
 0x191   : > { %1274 = vmatmul.msk.f32.gmra.mxu3 %vm218_vm1, %v213_v52 }
 0x195   : > { %v1617_v12 = vpop.f32.mrf.mxu0  ;;  %v1627_v17 = vpop.f32.mrf.mxu1 }
 0x196   : > { %2222 = vst [vmem:[#allocation10_spill] sm:$0xff] %v1617_v12 }
 0x197   : > { %v214_v53 = vpop.trf.xlu0  ;;  %2225 = vst [vmem:[#allocation13_spill] sm:$0xff] %v1627_v17 }
 0x198   : > { %1242 = vmatmul.msk.f32.gmra.mxu2 %vm218_vm1, %v214_v53 }
 0x199   : > { %1275 = vmatmul.msk.f32.gmra.mxu3 %vm218_vm1, %v214_v53 }
 0x19d   : > { %v1635_v23 = vpop.f32.mrf.mxu0  ;;  %v1645_v34 = vpop.f32.mrf.mxu1 }
 0x19e   : > { %2227 = vst [vmem:[#allocation15_spill] sm:$0xff] %v1635_v23 }
 0x19f   : > { %v215_v54 = vpop.trf.xlu0  ;;  %2230 = vst [vmem:[#allocation18_spill] sm:$0xff] %v1645_v34 }
 0x1a0   : > { %1243 = vmatmul.msk.f32.gmra.mxu2 %vm218_vm1, %v215_v54 }
 0x1a1   : > { %1276 = vmatmul.msk.f32.gmra.mxu3 %vm218_vm1, %v215_v54 }
 0x1a5   : > { %v1647_v35 = vpop.f32.mrf.mxu0  ;;  %v1657_v46 = vpop.f32.mrf.mxu1 }
 0x1a6   : > { %2231 = vst [vmem:[#allocation19_spill] sm:$0xff] %v1647_v35 }
 0x1a7   : > { %v216_v55 = vpop.trf.xlu0  ;;  %2234 = vst [vmem:[#allocation22_spill] sm:$0xff] %v1657_v46 }
 0x1a8   : > { %1244 = vmatmul.msk.f32.gmra.mxu2 %vm218_vm1, %v216_v55 }
 0x1a9   : > { %1277 = vmatmul.msk.f32.gmra.mxu3 %vm218_vm1, %v216_v55 }
 0x1ab   : > { %v1579_v57 = vpop.xlane.xlu1 %547 }
 0x1ad   : > { %v1659_v47 = vpop.f32.mrf.mxu0  ;;  %v1669_v52 = vpop.f32.mrf.mxu1 }
 0x1ae   : > { %2235 = vst [vmem:[#allocation23_spill] sm:$0xff] %v1659_v47 }
 0x1af   : > { %v217_v56 = vpop.trf.xlu0  ;;  %2238 = vst [vmem:[#allocation26_spill] sm:$0xff] %v1669_v52 }
 0x1b0   : > { %1245 = vmatmul.msk.f32.gmra.mxu2 %vm218_vm1, %v217_v56 }
 0x1b1   : > { %1278 = vmatmul.msk.f32.gmra.mxu3 %vm218_vm1, %v217_v56  ;;  %v582_v56 = vmax.f32 %v1617_v12, %v1627_v17 }
 0x1b3   : > { %v1585_v60 = vpop.xlane.xlu1 %550 }
 0x1b5   : > { %v1673_v54 = vpop.f32.mrf.mxu0 }
 0x1b6   : > { %2240 = vst [vmem:[#allocation28_spill] sm:$0xff] %v1673_v54 }
 0x1cb   : > { %v1589_v62 = vpop.xlane.xlu1 %559 }
 0x1dc   : > { %v1601_v4 = vpop.f32.mrf.mxu3 }
 0x1dd   : > { %2215 = vst [vmem:[#allocation3_spill] sm:$0xff] %v1601_v4 }
 0x1e3   : > { %v1607_v7 = vpop.f32.mrf.mxu2 }
 0x1e4   : > { %2218 = vst [vmem:[#allocation6_spill] sm:$0xff] %v1607_v7  ;;  %v1609_v8 = vpop.f32.mrf.mxu3 }
 0x1e5   : > { %2219 = vst [vmem:[#allocation7_spill] sm:$0xff] %v1609_v8  ;;  %v609_v9 = vmax.f32 %v1607_v7, %v1609_v8 }
 0x1e7   : > { %610 = vmax.xlane.f32.xlu2 %v609_v9 }
 0x1eb   : > { %v1615_v11 = vpop.f32.mrf.mxu2 }
 0x1ec   : > { %2221 = vst [vmem:[#allocation9_spill] sm:$0xff] %v1615_v11  ;;  %v1619_v13 = vpop.f32.mrf.mxu3 }
 0x1ed   : > { %2223 = vst [vmem:[#allocation11_spill] sm:$0xff] %v1619_v13  ;;  %v612_v15 = vmax.f32 %v1615_v11, %v1619_v13 }
 0x1ef   : > { %568 = vmax.xlane.f32.xlu2 %v567_v14  ;;  %613 = vmax.xlane.f32.xlu1 %v612_v15  ;;  %v1683_v15 = vpop.f32.mrf.mxu1 }
 0x1f0   : > { %2243 = vst [vmem:[#allocation31_spill] sm:$0xff] %v1683_v15 }
 0x1f3   : > { %v1625_v16 = vpop.f32.mrf.mxu2 }
 0x1f4   : > { %2224 = vst [vmem:[#allocation12_spill] sm:$0xff] %v1625_v16  ;;  %v1629_v18 = vpop.f32.mrf.mxu3 }
 0x1f5   : > { %2226 = vst [vmem:[#allocation14_spill] sm:$0xff] %v1629_v18  ;;  %v615_v22 = vmax.f32 %v1625_v16, %v1629_v18  ;;  %v2258_v18 = vmax.f32 %v1579_v57, %v1589_v62 }
 0x1f7   : > { %571 = vmax.xlane.f32.xlu1 %v570_v19  ;;  %616 = vmax.xlane.f32.xlu2 %v615_v22  ;;  %v585_v22 = vmax.f32 %v1635_v23, %v1645_v34 }
 0x1fb   : > { %v1637_v26 = vpop.f32.mrf.mxu2 }
 0x1fc   : > { %2228 = vst [vmem:[#allocation16_spill] sm:$0xff] %v1637_v26  ;;  %v1639_v27 = vpop.f32.mrf.mxu3 }
 0x1fd   : > { %2229 = vst [vmem:[#allocation17_spill] sm:$0xff] %v1639_v27  ;;  %v618_v31 = vmax.f32 %v1637_v26, %v1639_v27 }
 0x1ff   : > { %574 = vmax.xlane.f32.xlu2 %v573_v30  ;;  %619 = vmax.xlane.f32.xlu1 %v618_v31  ;;  %v1691_v31 = vpop.f32.mrf.mxu0 }
 0x200   : > { %2245 = vst [vmem:[#allocation33_spill] sm:$0xff] %v1691_v31 }
 0x203   : > { %v1649_v38 = vpop.f32.mrf.mxu2 }
 0x204   : > { %2232 = vst [vmem:[#allocation20_spill] sm:$0xff] %v1649_v38  ;;  %v1651_v39 = vpop.f32.mrf.mxu3 }
 0x205   : > { %2233 = vst [vmem:[#allocation21_spill] sm:$0xff] %v1651_v39  ;;  %v621_v43 = vmax.f32 %v1649_v38, %v1651_v39  ;;  %v566_v39 = vpop.xlane.xlu1 %565 }
 0x207   : > { %577 = vmax.xlane.f32.xlu1 %v576_v42  ;;  %622 = vmax.xlane.f32.xlu2 %v621_v43 }
 0x20b   : > { %v1661_v48 = vpop.f32.mrf.mxu2 }
 0x20c   : > { %2236 = vst [vmem:[#allocation24_spill] sm:$0xff] %v1661_v48  ;;  %v1663_v49 = vpop.f32.mrf.mxu3 }
 0x20d   : > { %2237 = vst [vmem:[#allocation25_spill] sm:$0xff] %v1663_v49  ;;  %v624_v51 = vmax.f32 %v1661_v48, %v1663_v49 }
 0x20f   : > { %580 = vmax.xlane.f32.xlu2 %v579_v50  ;;  %625 = vmax.xlane.f32.xlu1 %v624_v51  ;;  %v588_v50 = vmax.f32 %v1647_v35, %v1657_v46 }
 0x213   : > { %v1671_v53 = vpop.f32.mrf.mxu2 }
 0x214   : > { %2239 = vst [vmem:[#allocation27_spill] sm:$0xff] %v1671_v53  ;;  %v1675_v55 = vpop.f32.mrf.mxu3 }
 0x215   : > { %2241 = vst [vmem:[#allocation29_spill] sm:$0xff] %v1675_v55  ;;  %v627_v9 = vmax.f32 %v1671_v53, %v1675_v55 }
 0x217   : > { %583 = vmax.xlane.f32.xlu1 %v582_v56  ;;  %628 = vmax.xlane.f32.xlu2 %v627_v9  ;;  %v1701_v56 = vpop.f32.mrf.mxu1  ;;  %v1703_v9 = vpop.f32.mrf.mxu0 }
 0x218   : > { %2248 = vst [vmem:[#allocation36_spill] sm:$0xff] %v1701_v56 }
 0x219   : > { %2249 = vst [vmem:[#allocation37_spill] sm:$0xff] %v1703_v9 }
 0x21b   : > { %v1681_v14 = vpop.f32.mrf.mxu2 }
 0x21c   : > { %2242 = vst [vmem:[#allocation30_spill] sm:$0xff] %v1681_v14  ;;  %v1685_v19 = vpop.f32.mrf.mxu3 }
 0x21d   : > { %2244 = vst [vmem:[#allocation32_spill] sm:$0xff] %v1685_v19  ;;  %v630_v30 = vmax.f32 %v1681_v14, %v1685_v19  ;;  %v554_v14 = vpop.xlane.xlu2 %553 }
 0x21f   : > { %586 = vmax.xlane.f32.xlu2 %v585_v22  ;;  %631 = vmax.xlane.f32.xlu1 %v630_v30  ;;  %v594_v22 = vmax.f32 %v1673_v54, %v1683_v15  ;;  %v591_v30 = vmax.f32 %v1659_v47, %v1669_v52  ;;  %v1709_v0 = vpop.f32.mrf.mxu1  ;;  %v1711_v10 = vpop.f32.mrf.mxu0 }
 0x220   : > { %2250 = vst [vmem:[#allocation38_spill] sm:$0xff] %v1709_v0 }
 0x221   : > { %2251 = vst [vmem:[#allocation39_spill] sm:$0xff] %v1711_v10 }
 0x223   : > { %v1693_v42 = vpop.f32.mrf.mxu2 }
 0x224   : > { %2246 = vst [vmem:[#allocation34_spill] sm:$0xff] %v1693_v42  ;;  %v1695_v43 = vpop.f32.mrf.mxu3 }
 0x225   : > { %2247 = vst [vmem:[#allocation35_spill] sm:$0xff] %v1695_v43  ;;  %v633_v51 = vmax.f32 %v1693_v42, %v1695_v43  ;;  %v600_v43 = vmax.f32 %v1703_v9, %v1709_v0  ;;  %v557_v49 = vpop.xlane.xlu2 %556 }
 0x227   : > { %589 = vmax.xlane.f32.xlu1 %v588_v50  ;;  %634 = vmax.xlane.f32.xlu2 %v633_v51  ;;  %v597_v50 = vmax.f32 %v1691_v31, %v1701_v56  ;;  %v1721_v54 = vpop.f32.mrf.mxu1 }
 0x228   : > { %2254 = vst [vmem:[#allocation42_spill] sm:$0xff] %v1721_v54 }
 0x22b   : > { %v1717_v51 = vpop.f32.mrf.mxu2 }
 0x22c   : > { %2252 = vst [vmem:[#allocation40_spill] sm:$0xff] %v1717_v51  ;;  %v1719_v42 = vpop.f32.mrf.mxu3 }
 0x22d   : > { %2253 = vst [vmem:[#allocation41_spill] sm:$0xff] %v1719_v42  ;;  %v563_v48 = vpop.xlane.xlu2 %562 }
 0x22e   : > { %v643_v0 = vmax.f32 %v1585_v60, %v563_v48 }
 0x22f   : > { %595 = vmax.xlane.f32.xlu1 %v594_v22  ;;  %592 = vmax.xlane.f32.xlu2 %v591_v30  ;;  %v1723_v22 = vpop.f32.mrf.mxu0  ;;  %v603_v30 = vmax.f32 %v1711_v10, %v1721_v54 }
 0x230   : > { %2255 = vst [vmem:[#allocation43_spill] sm:$0xff] %v1723_v22  ;;  %v606_v19 = vmax.f32 %v1723_v22, %v1601_v4 }
 0x233   : > { %v1729_v55 = vpop.f32.mrf.mxu2 }
 0x234   : > { %2256 = vst [vmem:[#allocation44_spill] sm:$0xff] %v1729_v55  ;;  %v1731_v53 = vpop.f32.mrf.mxu3 }
 0x235   : > { %2257 = vst [vmem:[#allocation45_spill] sm:$0xff] %v1731_v53 }
 0x237   : > { %601 = vmax.xlane.f32.xlu1 %v600_v43  ;;  %598 = vmax.xlane.f32.xlu2 %v597_v50  ;;  %v639_v43 = vmax.f32 %v1729_v55, %v1731_v53  ;;  %v636_v50 = vmax.f32 %v1717_v51, %v1719_v42 }
 0x23f   : > { %607 = vmax.xlane.f32.xlu1 %v606_v19  ;;  %604 = vmax.xlane.f32.xlu2 %v603_v30 }
 0x247   : > { %637 = vmax.xlane.f32.xlu1 %v636_v50  ;;  %640 = vmax.xlane.f32.xlu2 %v639_v43 }
 0x25a   : > { %v611_v38 = vpop.xlane.xlu2 %610 }
 0x262   : > { %v569_v27 = vpop.xlane.xlu2 %568  ;;  %v614_v26 = vpop.xlane.xlu1 %613 }
 0x263   : > { %v645_v31 = vmax.f32 %v557_v49, %v569_v27 }
 0x26a   : > { %v572_v19 = vpop.xlane.xlu1 %571  ;;  %v617_v30 = vpop.xlane.xlu2 %616 }
 0x26b   : > { %v646_v16 = vmax.f32 %v2258_v18, %v572_v19  ;;  %v644_v18 = vmax.f32 %v554_v14, %v566_v39 }
 0x272   : > { %v575_v13 = vpop.xlane.xlu2 %574  ;;  %v620_v11 = vpop.xlane.xlu1 %619 }
 0x273   : > { %v647_v9 = vmax.f32 %v643_v0, %v575_v13 }
 0x27a   : > { %v578_v53 = vpop.xlane.xlu1 %577  ;;  %v623_v55 = vpop.xlane.xlu2 %622 }
 0x27b   : > { %v648_v15 = vmax.f32 %v644_v18, %v578_v53 }
 0x282   : > { %v581_v8 = vpop.xlane.xlu2 %580  ;;  %v626_v42 = vpop.xlane.xlu1 %625 }
 0x283   : > { %v649_v52 = vmax.f32 %v645_v31, %v581_v8 }
 0x28a   : > { %v584_v50 = vpop.xlane.xlu1 %583  ;;  %v629_v43 = vpop.xlane.xlu2 %628 }
 0x28b   : > { %v650_v46 = vmax.f32 %v646_v16, %v584_v50 }
 0x292   : > { %v587_v51 = vpop.xlane.xlu2 %586  ;;  %v632_v7 = vpop.xlane.xlu1 %631 }
 0x293   : > { %v651_v56 = vmax.f32 %v647_v9, %v587_v51 }
 0x29a   : > { %v590_v4 = vpop.xlane.xlu1 %589  ;;  %v635_v22 = vpop.xlane.xlu2 %634 }
 0x29b   : > { %v652_v47 = vmax.f32 %v648_v15, %v590_v4 }
 0x2a2   : > { %v596_v54 = vpop.xlane.xlu1 %595  ;;  %v593_v10 = vpop.xlane.xlu2 %592 }
 0x2a3   : > { %v654_v35 = vmax.f32 %v650_v46, %v596_v54  ;;  %v653_v23 = vmax.f32 %v649_v52, %v593_v10 }
 0x2aa   : > { %v602_v57 = vpop.xlane.xlu1 %601  ;;  %v599_v62 = vpop.xlane.xlu2 %598 }
 0x2ab   : > { %v655_v19 = vmax.f32 %v651_v56, %v599_v62  ;;  %v656_v17 = vmax.f32 %v652_v47, %v602_v57 }
 0x2ad   : > { %v659_v34 = vmax.f32 %v655_v19, %v611_v38  ;;  %v660_v0 = vmax.f32 %v656_v17, %v614_v26 }
 0x2af   : > { %v663_v5 = vmax.f32 %v659_v34, %v623_v55  ;;  %v664_v14 = vmax.f32 %v660_v0, %v626_v42 }
 0x2b1   : > { %v667_v9 = vmax.f32 %v663_v5, %v635_v22 }
 0x2b2   : > { %v608_v12 = vpop.xlane.xlu1 %607  ;;  %v605_v6 = vpop.xlane.xlu2 %604 }
 0x2b3   : > { %v658_v3 = vmax.f32 %v654_v35, %v608_v12  ;;  %v657_v60 = vmax.f32 %v653_v23, %v605_v6 }
 0x2b5   : > { %v662_v13 = vmax.f32 %v658_v3, %v620_v11  ;;  %v661_v48 = vmax.f32 %v657_v60, %v617_v30 }
 0x2b7   : > { %v666_v39 = vmax.f32 %v662_v13, %v632_v7  ;;  %v665_v27 = vmax.f32 %v661_v48, %v629_v43 }
 0x2b9   : > { %v670_v49 = vmax.f32 %v666_v39, %v667_v9 }
 0x2ba   : > { %v638_v8 = vpop.xlane.xlu1 %637  ;;  %v641_v16 = vpop.xlane.xlu2 %640 }
 0x2bb   : > { %v668_v4 = vmax.f32 %v664_v14, %v638_v8  ;;  %v669_v38 = vmax.f32 %v665_v27, %v641_v16 }
 0x2bd   : > { %v671_v46 = vmax.f32 %v668_v4, %v669_v38  ;;  %v2265_v38 = vld [vmem:[#allocation10_spill] sm:$0xff] }
 0x2bf   : > { %v672_v10 = vmax.f32 %v670_v49, %v671_v46 }
 0x2c1   : > { %v673_v47 = vrot.slane %v672_v10, 4 }
 0x2c3   : > { %v674_v52 = vmax.f32 %v672_v10, %v673_v47 }
 0x2c5   : > { %v675_v53 = vrot.slane %v674_v52, 2 }
 0x2c7   : > { %v676_v34 = vmax.f32 %v674_v52, %v675_v53  ;;  %v2266_v52 = vld [vmem:[#allocation13_spill] sm:$0xff] }
 0x2c9   : > { %v677_v12 = vrot.slane %v676_v34, 1 }
 0x2cb   : > { %v1741_v6 = vmax.f32 %v676_v34, %v677_v12 }
 0x2cd   : > { %v679_v3 = vsub.f32 %v1505_v20, %v1741_v6  ;;  %v680_v5 = vsub.f32 %v1507_v21, %v1741_v6  ;;  %v681_v7 = vsub.f32 %v1513_v24, %v1741_v6  ;;  %v682_v11 = vsub.f32 %v1515_v25, %v1741_v6 }
 0x2ce   : > { %v683_v17 = vsub.f32 %v1521_v28, %v1741_v6  ;;  %v684_v26 = vsub.f32 %v1523_v29, %v1741_v6  ;;  %v685_v20 = vsub.f32 %v1529_v32, %v1741_v6  ;;  %v686_v21 = vsub.f32 %v1531_v33, %v1741_v6 }
 0x2cf   : > { %v743_v23 = vmul.f32 1.442695, %v679_v3  ;;  %v745_v35 = vmul.f32 1.442695, %v680_v5  ;;  %v747_v54 = vmul.f32 1.442695, %v681_v7  ;;  %v687_v24 = vsub.f32 %v1537_v36, %v1741_v6 }
 0x2d0   : > { %v749_v55 = vmul.f32 1.442695, %v682_v11  ;;  %v751_v25 = vmul.f32 1.442695, %v683_v17  ;;  %v688_v28 = vsub.f32 %v1539_v37, %v1741_v6  ;;  %v753_v15 = vmul.f32 1.442695, %v684_v26 }
 0x2d1   : > { %1298 = vpow2.f32 %v743_v23  ;;  %v689_v29 = vsub.f32 %v1545_v40, %v1741_v6  ;;  %v755_v32 = vmul.f32 1.442695, %v685_v20  ;;  %v690_v31 = vsub.f32 %v1547_v41, %v1741_v6  ;;  %v2267_v3 = vld [vmem:[#allocation15_spill] sm:$0xff]  ;;  %v2269_v20 = vld [vmem:[#allocation18_spill] sm:$0xff] }
 0x2d2   : > { %1300 = vpow2.f32 %v745_v35  ;;  %v757_v33 = vmul.f32 1.442695, %v686_v21  ;;  %v691_v36 = vsub.f32 %v1553_v44, %v1741_v6  ;;  %v759_v42 = vmul.f32 1.442695, %v687_v24  ;;  %v2268_v17 = vld [vmem:[#allocation19_spill] sm:$0xff] }
 0x2d3   : > { %1302 = vpow2.f32 %v747_v54  ;;  %v692_v37 = vsub.f32 %v1555_v45, %v1741_v6  ;;  %v761_v56 = vmul.f32 1.442695, %v688_v28  ;;  %v693_v40 = vsub.f32 %v1581_v58, %v1741_v6  ;;  %v2270_v24 = vld [vmem:[#allocation23_spill] sm:$0xff] }
 0x2d4   : > { %1304 = vpow2.f32 %v749_v55  ;;  %v763_v22 = vmul.f32 1.442695, %v689_v29  ;;  %v694_v30 = vsub.f32 %v1583_v59, %v1741_v6  ;;  %v765_v44 = vmul.f32 1.442695, %v690_v31  ;;  %v2271_v29 = vld [vmem:[#allocation22_spill] sm:$0xff] }
 0x2d5   : > { %1306 = vpow2.f32 %v751_v25  ;;  %v695_v45 = vsub.f32 %v1587_v61, %v1741_v6  ;;  %v767_v43 = vmul.f32 1.442695, %v691_v36  ;;  %v696_v58 = vsub.f32 %v1591_v63, %v1741_v6  ;;  %v2262_v63 = vld [vmem:[#allocation2_spill] sm:$0xff] }
 0x2d6   : > { %1308 = vpow2.f32 %v753_v15  ;;  %v769_v62 = vmul.f32 1.442695, %v692_v37  ;;  %v697_v59 = vsub.f32 %v1595_v1, %v1741_v6  ;;  %v771_v19 = vmul.f32 1.442695, %v693_v40  ;;  %v2263_v1 = vld [vmem:[#allocation4_spill] sm:$0xff]  ;;  %v2272_v36 = vld [vmem:[#allocation26_spill] sm:$0xff] }
 0x2d7   : > { %v1771_v51 = vpop.eup %1298  ;;  %1310 = vpow2.f32 %v755_v32  ;;  %v698_v61 = vsub.f32 %v1597_v2, %v1741_v6  ;;  %v773_v0 = vmul.f32 1.442695, %v694_v30  ;;  %v699_v48 = vsub.f32 %v2262_v63, %v1741_v6  ;;  %v2264_v2 = vld [vmem:[#allocation5_spill] sm:$0xff]  ;;  %v2273_v40 = vld [vmem:[#allocation31_spill] sm:$0xff] }
 0x2d8   : > { %v1775_v41 = vpop.eup %1300  ;;  %1312 = vpow2.f32 %v757_v33  ;;  %v775_v9 = vmul.f32 1.442695, %v695_v45  ;;  %v700_v14 = vsub.f32 %v2263_v1, %v1741_v6  ;;  %v777_v27 = vmul.f32 1.442695, %v696_v58  ;;  %v2274_v45 = vld [vmem:[#allocation33_spill] sm:$0xff] }
 0x2d9   : > { %2259 = vst [vmem:[#allocation46_spill] sm:$0xff] %v1775_v41  ;;  %v1779_v50 = vpop.eup %1302  ;;  %1314 = vpow2.f32 %v759_v42  ;;  %v701_v8 = vsub.f32 %v2264_v2, %v1741_v6  ;;  %v779_v16 = vmul.f32 1.442695, %v697_v59  ;;  %v703_v46 = vsub.f32 %v2265_v38, %v1741_v6  ;;  %v2275_v59 = vld [vmem:[#allocation36_spill] sm:$0xff]  ;;  %v2276_v63 = vld [vmem:[#allocation37_spill] sm:$0xff] }
 0x2da   : > { %v1783_v57 = vpop.eup %1304  ;;  %1316 = vpow2.f32 %v761_v56  ;;  %v781_v10 = vmul.f32 1.442695, %v698_v61  ;;  %v704_v53 = vsub.f32 %v2266_v52, %v1741_v6  ;;  %v783_v34 = vmul.f32 1.442695, %v699_v48  ;;  %v2279_v52 = vld [vmem:[#allocation42_spill] sm:$0xff] }
 0x2db   : > { %2260 = vst [vmem:[#allocation47_spill] sm:$0xff] %v1783_v57  ;;  %v1787_v18 = vpop.eup %1306  ;;  %1318 = vpow2.f32 %v763_v22  ;;  %v705_v5 = vsub.f32 %v2267_v3, %v1741_v6  ;;  %v785_v7 = vmul.f32 1.442695, %v700_v14  ;;  %v707_v23 = vsub.f32 %v2268_v17, %v1741_v6  ;;  %v2277_v14 = vld [vmem:[#allocation38_spill] sm:$0xff] }
 0x2dc   : > { %v1791_v60 = vpop.eup %1308  ;;  %1320 = vpow2.f32 %v765_v44  ;;  %v787_v26 = vmul.f32 1.442695, %v701_v8  ;;  %v706_v54 = vsub.f32 %v2269_v20, %v1741_v6  ;;  %v791_v21 = vmul.f32 1.442695, %v703_v46 }
 0x2dd   : > { %2261 = vst [vmem:[#allocation48_spill] sm:$0xff] %v1791_v60  ;;  %v1795_v13 = vpop.eup %1310  ;;  %1322 = vpow2.f32 %v767_v43  ;;  %v709_v25 = vsub.f32 %v2270_v24, %v1741_v6  ;;  %v793_v28 = vmul.f32 1.442695, %v704_v53  ;;  %v708_v32 = vsub.f32 %v2271_v29, %v1741_v6 }
 0x2de   : > { %v1799_v39 = vpop.eup %1312  ;;  %1324 = vpow2.f32 %v769_v62  ;;  %v795_v31 = vmul.f32 1.442695, %v705_v5  ;;  %v710_v42 = vsub.f32 %v2272_v36, %v1741_v6  ;;  %v799_v37 = vmul.f32 1.442695, %v707_v23  ;;  %v2280_v5 = vld [vmem:[#allocation43_spill] sm:$0xff]  ;;  %v2284_v36 = vld [vmem:[#allocation9_spill] sm:$0xff] }
 0x2df   : > { %v1803_v49 = vpop.eup %1314  ;;  %1326 = vpow2.f32 %v771_v19  ;;  %v712_v22 = vsub.f32 %v2273_v40, %v1741_v6  ;;  %v797_v30 = vmul.f32 1.442695, %v706_v54  ;;  %v713_v43 = vsub.f32 %v2274_v45, %v1741_v6  ;;  %v2282_v54 = vld [vmem:[#allocation6_spill] sm:$0xff]  ;;  %v2286_v45 = vld [vmem:[#allocation12_spill] sm:$0xff] }
 0x2e0   : > { %v1807_v4 = vpop.eup %1316  ;;  %1328 = vpow2.f32 %v773_v0  ;;  %v803_v58 = vmul.f32 1.442695, %v709_v25  ;;  %v714_v19 = vsub.f32 %v2275_v59, %v1741_v6  ;;  %v801_v61 = vmul.f32 1.442695, %v708_v32  ;;  %v2283_v32 = vld [vmem:[#allocation7_spill] sm:$0xff] }
 0x2e1   : > { %v1811_v47 = vpop.eup %1318  ;;  %1330 = vpow2.f32 %v775_v9  ;;  %v715_v48 = vsub.f32 %v2276_v63, %v1741_v6  ;;  %v805_v9 = vmul.f32 1.442695, %v710_v42  ;;  %v809_v2 = vmul.f32 1.442695, %v712_v22  ;;  %v2285_v22 = vld [vmem:[#allocation11_spill] sm:$0xff] }
 0x2e2   : > { %v1815_v12 = vpop.eup %1320  ;;  %1332 = vpow2.f32 %v777_v27  ;;  %v716_v27 = vsub.f32 %v2277_v14, %v1741_v6  ;;  %v811_v46 = vmul.f32 1.442695, %v713_v43  ;;  %v718_v53 = vsub.f32 %v2279_v52, %v1741_v6 }
 0x2e3   : > { %v1819_v11 = vpop.eup %1322  ;;  %1334 = vpow2.f32 %v779_v16  ;;  %v2278_v16 = vld [vmem:[#allocation39_spill] sm:$0xff]  ;;  %v815_v17 = vmul.f32 1.442695, %v715_v48  ;;  %v723_v42 = vsub.f32 %v2284_v36, %v1741_v6  ;;  %v725_v43 = vsub.f32 %v2286_v45, %v1741_v6  ;;  %v2293_v36 = vld [vmem:[#allocation24_spill] sm:$0xff] }
 0x2e4   : > { %v1823_v35 = vpop.eup %1324  ;;  %1336 = vpow2.f32 %v781_v10  ;;  %v717_v38 = vsub.f32 %v2278_v16, %v1741_v6  ;;  %v817_v24 = vmul.f32 1.442695, %v716_v27  ;;  %v874_v14 = vadd.f32 %v1783_v57, %v1779_v50  ;;  %v2287_v16 = vld [vmem:[#allocation14_spill] sm:$0xff] }
 0x2e5   : > { %v1827_v55 = vpop.eup %1326  ;;  %1338 = vpow2.f32 %v783_v34  ;;  %v813_v34 = vmul.f32 1.442695, %v714_v19  ;;  %v871_v27 = vadd.f32 %v1775_v41, %v1771_v51  ;;  %v835_v45 = vmul.f32 1.442695, %v725_v43 }
 0x2e6   : > { %v1831_v15 = vpop.eup %1328  ;;  %1340 = vpow2.f32 %v785_v7  ;;  %v719_v7 = vsub.f32 %v2280_v5, %v1741_v6  ;;  %v2289_v5 = vld [vmem:[#allocation17_spill] sm:$0xff]  ;;  %875 = vadd.xlane.f32.xlu2 %v874_v14 }
 0x2e7   : > { %v1835_v33 = vpop.eup %1330  ;;  %1342 = vpow2.f32 %v787_v26  ;;  %v2281_v26 = vld [vmem:[#allocation3_spill] sm:$0xff]  ;;  %872 = vadd.xlane.f32.xlu1 %v871_v27 }
 0x2e8   : > { %v1839_v56 = vpop.eup %1332  ;;  %1344 = vpow2.f32 %v791_v21  ;;  %v720_v20 = vsub.f32 %v2281_v26, %v1741_v6  ;;  %v721_v21 = vsub.f32 %v2282_v54, %v1741_v6 }
 0x2e9   : > { %v1843_v44 = vpop.eup %1334  ;;  %1346 = vpow2.f32 %v793_v28  ;;  %v819_v28 = vmul.f32 1.442695, %v717_v38  ;;  %v726_v38 = vsub.f32 %v2287_v16, %v1741_v6  ;;  %v2298_v16 = vld [vmem:[#allocation30_spill] sm:$0xff] }
 0x2ea   : > { %v1847_v62 = vpop.eup %1336  ;;  %1348 = vpow2.f32 %v795_v31  ;;  %v722_v31 = vsub.f32 %v2283_v32, %v1741_v6  ;;  %v825_v19 = vmul.f32 1.442695, %v720_v20  ;;  %v831_v20 = vmul.f32 1.442695, %v723_v42  ;;  %v2294_v42 = vld [vmem:[#allocation25_spill] sm:$0xff] }
 0x2eb   : > { %v1851_v0 = vpop.eup %1338  ;;  %1350 = vpow2.f32 %v799_v37  ;;  %v821_v37 = vmul.f32 1.442695, %v718_v53  ;;  %v837_v14 = vmul.f32 1.442695, %v726_v38 }
 0x2ec   : > { %v1855_v1 = vpop.eup %1340  ;;  %1352 = vpow2.f32 %v797_v30  ;;  %v724_v30 = vsub.f32 %v2285_v22, %v1741_v6  ;;  %v829_v53 = vmul.f32 1.442695, %v722_v31  ;;  %v732_v22 = vsub.f32 %v2294_v42, %v1741_v6 }
 0x2ed   : > { %v1859_v8 = vpop.eup %1342  ;;  %1354 = vpow2.f32 %v803_v58  ;;  %v823_v58 = vmul.f32 1.442695, %v719_v7  ;;  %v728_v7 = vsub.f32 %v2289_v5, %v1741_v6  ;;  %v2299_v5 = vld [vmem:[#allocation32_spill] sm:$0xff] }
 0x2ee   : > { %v1863_v10 = vpop.eup %1344  ;;  %1356 = vpow2.f32 %v801_v61  ;;  %v827_v61 = vmul.f32 1.442695, %v721_v21  ;;  %v2292_v21 = vld [vmem:[#allocation21_spill] sm:$0xff]  ;;  %v1016_v38 = vpack.c.bf16 %v1859_v8, %v1851_v0  ;;  %v849_v57 = vmul.f32 1.442695, %v732_v22 }
 0x2ef   : > { %v1867_v3 = vpop.eup %1346  ;;  %1358 = vpow2.f32 %v805_v9  ;;  %v877_v9 = vadd.f32 %v1791_v60, %v1787_v18  ;;  %v841_v42 = vmul.f32 1.442695, %v728_v7 }
 0x2f0   : > { %v1871_v23 = vpop.eup %1348  ;;  %1360 = vpow2.f32 %v809_v2 }
 0x2f1   : > { %v1877_v25 = vpop.eup %1350  ;;  %1362 = vpow2.f32 %v811_v46  ;;  %v2288_v46 = vld [vmem:[#allocation16_spill] sm:$0xff]  ;;  %878 = vadd.xlane.f32.xlu0 %v877_v9  ;;  %v1018_v32 = vpack.c.bf16 %v1871_v23, %v1863_v10 }
 0x2f2   : > { %v1879_v29 = vpop.eup %1352  ;;  %1364 = vpow2.f32 %v813_v34  ;;  %v727_v52 = vsub.f32 %v2288_v46, %v1741_v6  ;;  %v735_v46 = vsub.f32 %v2298_v16, %v1741_v6  ;;  %v2304_v16 = vld [vmem:[#allocation40_spill] sm:$0xff] }
 0x2f3   : > { %v1885_v40 = vpop.eup %1354  ;;  %1366 = vpow2.f32 %v815_v17  ;;  %v2290_v17 = vld [vmem:[#allocation20_spill] sm:$0xff] }
 0x2f4   : > { %v1891_v59 = vpop.eup %1356  ;;  %1368 = vpow2.f32 %v817_v24  ;;  %v1020_v63 = vpack.c.bf16 %v1885_v40, %v1877_v25  ;;  %v729_v26 = vsub.f32 %v2290_v17, %v1741_v6  ;;  %v730_v24 = vsub.f32 %v2292_v21, %v1741_v6  ;;  %v2301_v21 = vld [vmem:[#allocation34_spill] sm:$0xff] }
 0x2f5   : > { %v1895_v48 = vpop.eup %1358  ;;  %1370 = vpow2.f32 %v819_v28  ;;  %v833_v28 = vmul.f32 1.442695, %v724_v30  ;;  %v2297_v30 = vld [vmem:[#allocation29_spill] sm:$0xff]  ;;  %v839_v43 = vmul.f32 1.442695, %v727_v52  ;;  %v883_v52 = vadd.f32 %v1807_v4, %v1803_v49 }
 0x2f6   : > { %v1903_v2 = vpop.eup %1360  ;;  %1372 = vpow2.f32 %v821_v37  ;;  %1038 = vmatpush.bf16.msrb.mxu2 %v1020_v63  ;;  %v731_v37 = vsub.f32 %v2293_v36, %v1741_v6  ;;  %v2296_v63 = vld [vmem:[#allocation27_spill] sm:$0xff]  ;;  %v734_v9 = vsub.f32 %v2297_v30, %v1741_v6  ;;  %v737_v36 = vsub.f32 %v2301_v21, %v1741_v6 }
 0x2f7   : > { %v1909_v34 = vpop.eup %1362  ;;  %1374 = vpow2.f32 %v823_v58  ;;  %v843_v30 = vmul.f32 1.442695, %v729_v26  ;;  %v845_v7 = vmul.f32 1.442695, %v730_v24  ;;  %884 = vadd.xlane.f32.xlu2 %v883_v52  ;;  %v1014_v24 = vpack.c.bf16 %v1843_v44, %v1835_v33 }
 0x2f8   : > { %v1915_v54 = vpop.eup %1364  ;;  %1376 = vpow2.f32 %v825_v19  ;;  %v733_v19 = vsub.f32 %v2296_v63, %v1741_v6  ;;  %v847_v26 = vmul.f32 1.442695, %v731_v37 }
 0x2f9   : > { %2291 = vst [vmem:[#allocation2_spill] sm:$0xff] %v1915_v54  ;;  %v1921_v31 = vpop.eup %1366  ;;  %1378 = vpow2.f32 %v827_v61  ;;  %v736_v61 = vsub.f32 %v2299_v5, %v1741_v6  ;;  %v739_v5 = vsub.f32 %v2304_v16, %v1741_v6  ;;  %v853_v16 = vmul.f32 1.442695, %v734_v9 }
 0x2fa   : > { %v1927_v58 = vpop.eup %1368  ;;  %1380 = vpow2.f32 %v829_v53  ;;  %1039 = vmatpush.bf16.msrb.mxu2 %v1018_v32  ;;  %v2302_v32 = vld [vmem:[#allocation35_spill] sm:$0xff]  ;;  %v851_v60 = vmul.f32 1.442695, %v733_v19 }
 0x2fb   : > { %2295 = vst [vmem:[#allocation4_spill] sm:$0xff] %v1927_v58  ;;  %v1933_v27 = vpop.eup %1370  ;;  %1382 = vpow2.f32 %v831_v20  ;;  %v738_v63 = vsub.f32 %v2302_v32, %v1741_v6  ;;  %v2305_v32 = vld [vmem:[#allocation41_spill] sm:$0xff]  ;;  %v1975_v22 = vadd.f32 %v1927_v58, %v1921_v31  ;;  %v857_v37 = vmul.f32 1.442695, %v736_v61 }
 0x2fc   : > { %v1939_v17 = vpop.eup %1372  ;;  %1384 = vpow2.f32 %v833_v28  ;;  %v880_v28 = vadd.f32 %v1799_v39, %v1795_v13 }
 0x2fd   : > { %2300 = vst [vmem:[#allocation5_spill] sm:$0xff] %v1939_v17  ;;  %v1945_v53 = vpop.eup %1374  ;;  %1386 = vpow2.f32 %v835_v45  ;;  %v740_v45 = vsub.f32 %v2305_v32, %v1741_v6  ;;  %v1989_v9 = vadd.f32 %v1939_v17, %v1933_v27  ;;  %v2309_v32 = vld [vmem:[#allocation44_spill] sm:$0xff]  ;;  %v889_v17 = vadd.f32 %v1823_v35, %v1819_v11 }
 0x2fe   : > { %v1951_v20 = vpop.eup %1376  ;;  %1388 = vpow2.f32 %v837_v14  ;;  %1040 = vmatpush.bf16.msrb.mxu2 %v1016_v38  ;;  %881 = vadd.xlane.f32.xlu1 %v880_v28  ;;  %v1967_v14 = vadd.f32 %v1895_v48, %v1885_v40  ;;  %v861_v61 = vmul.f32 1.442695, %v738_v63 }
 0x2ff   : > { %2303 = vst [vmem:[#allocation10_spill] sm:$0xff] %v1951_v20  ;;  %v1957_v21 = vpop.eup %1378  ;;  %1390 = vpow2.f32 %v839_v43  ;;  %v1981_v43 = vadd.f32 %v1915_v54, %v1909_v34  ;;  %v1985_v40 = vadd.f32 %v1951_v20, %v1945_v53  ;;  %v1012_v54 = vpack.c.bf16 %v1827_v55, %v1819_v11  ;;  %890 = vadd.xlane.f32.xlu2 %v889_v17 }
 0x300   : > { %v1961_v41 = vpop.eup %1380  ;;  %1392 = vpow2.f32 %v841_v42  ;;  %v865_v63 = vmul.f32 1.442695, %v740_v45 }
 0x301   : > { %2306 = vst [vmem:[#allocation13_spill] sm:$0xff] %v1961_v41  ;;  %v1969_v38 = vpop.eup %1382  ;;  %1394 = vpow2.f32 %v843_v30  ;;  %v855_v30 = vmul.f32 1.442695, %v735_v46  ;;  %v859_v46 = vmul.f32 1.442695, %v737_v36 }
 0x302   : > { %v1977_v19 = vpop.eup %1384  ;;  %1396 = vpow2.f32 %v845_v7  ;;  %1041 = vmatpush.bf16.msrb.mxu2 %v1014_v24  ;;  %v1999_v7 = vadd.f32 %v1961_v41, %v1957_v21  ;;  %v741_v24 = vsub.f32 %v2309_v32, %v1741_v6  ;;  %v2311_v32 = vld [vmem:[#allocation45_spill] sm:$0xff]  ;;  %v863_v36 = vmul.f32 1.442695, %v739_v5  ;;  %v2313_v41 = vld [vmem:[#allocation8_spill] sm:$0xff] }
 0x303   : > { %v1991_v42 = vpop.eup %1386  ;;  %1398 = vpow2.f32 %v847_v26  ;;  %v1995_v52 = vadd.f32 %v1977_v19, %v1969_v38 }
 0x304   : > { %2308 = vst [vmem:[#allocation19_spill] sm:$0xff] %v1999_v7  ;;  %v2001_v28 = vpop.eup %1388  ;;  %1400 = vpow2.f32 %v849_v57  ;;  %v742_v57 = vsub.f32 %v2311_v32, %v1741_v6  ;;  %v702_v32 = vsub.f32 %v2313_v41, %v1741_v6 }
 0x305   : > { %2307 = vst [vmem:[#allocation15_spill] sm:$0xff] %v1995_v52  ;;  %v2007_v26 = vpop.eup %1390  ;;  %1402 = vpow2.f32 %v851_v60  ;;  %v2013_v58 = vadd.f32 %v2001_v28, %v1991_v42  ;;  %v886_v52 = vadd.f32 %v1815_v12, %v1811_v47 }
 0x306   : > { %v2015_v7 = vpop.eup %1392  ;;  %1404 = vpow2.f32 %v853_v16  ;;  %1042 = vmatpush.bf16.msrb.mxu2 %v1012_v54  ;;  %v1010_v54 = vpack.c.bf16 %v1811_v47, %v1803_v49  ;;  %v789_v49 = vmul.f32 1.442695, %v702_v32  ;;  %v1008_v47 = vpack.c.bf16 %v1795_v13, %v1787_v18 }
 0x307   : > { %2310 = vst [vmem:[#allocation18_spill] sm:$0xff] %v2013_v58  ;;  %v2021_v60 = vpop.eup %1394  ;;  %1406 = vpow2.f32 %v855_v30  ;;  %v2025_v11 = vadd.f32 %v2015_v7, %v2007_v26  ;;  %887 = vadd.xlane.f32.xlu1 %v886_v52  ;;  %v867_v30 = vmul.f32 1.442695, %v741_v24  ;;  %v895_v52 = vadd.f32 %v1839_v56, %v1835_v33 }
 0x308   : > { %v2027_v58 = vpop.eup %1396  ;;  %1408 = vpow2.f32 %v857_v37  ;;  %v1006_v33 = vpack.c.bf16 %v1779_v50, %v1771_v51  ;;  %v901_v51 = vadd.f32 %v1855_v1, %v1851_v0  ;;  %v1019_v50 = vpack.c.bf16 %v1879_v29, %v1867_v3  ;;  %v2315_v0 = vld [vmem:[#allocation28_spill] sm:$0xff] }
 0x309   : > { %2312 = vst [vmem:[#allocation23_spill] sm:$0xff] %v2025_v11  ;;  %v1399_v16 = vpop.eup %1398  ;;  %1410 = vpow2.f32 %v859_v46  ;;  %v2035_v17 = vadd.f32 %v2027_v58, %v2021_v60  ;;  %v869_v11 = vmul.f32 1.442695, %v742_v57  ;;  %v892_v57 = vadd.f32 %v1831_v15, %v1827_v55  ;;  %896 = vadd.xlane.f32.xlu2 %v895_v52 }
 0x30a   : > { %v2037_v5 = vpop.eup %1400  ;;  %1412 = vpow2.f32 %v861_v61  ;;  %1043 = vmatpush.bf16.msrb.mxu2 %v1010_v54  ;;  %v146_v54 = vld [vmem:[%s1465_s14 + $0x10] sm:$0xf] }
 0x30b   : > { %v1403_v20 = vpop.eup %1402  ;;  %1414 = vpow2.f32 %v863_v36  ;;  %v2040_v41 = vadd.f32 %v2037_v5, %v1399_v16  ;;  %v1004_v52 = vpack.c.bf16 %v146_v54, %v146_v54  ;;  %v711_v54 = vsub.f32 %v2315_v0, %v1741_v6 }
 0x30c   : > { %v2042_v45 = vpop.eup %1404  ;;  %1416 = vpow2.f32 %v865_v63  ;;  %v1013_v6 = vpack.c.bf16 %v1831_v15, %v1823_v35  ;;  %v1026_v35 = vpack.c.bf16 %v1957_v21, %v1945_v53  ;;  %v2316_v15 = vld [vmem:[#allocation48_spill] sm:$0xff] }
 0x30d   : > { %v1407_v37 = vpop.eup %1406  ;;  %1418 = vpow2.f32 %v867_v30  ;;  %v2049_v24 = vadd.f32 %v2042_v45, %v1403_v20 }
 0x30e   : > { %v2051_v46 = vpop.eup %1408  ;;  %1420 = vpow2.f32 %v869_v11  ;;  %1044 = vmatpush.bf16.msrb.mxu2 %v1008_v47  ;;  %v1021_v11 = vpack.c.bf16 %v1895_v48, %v1891_v59 }
 0x30f   : > { %v1411_v61 = vpop.eup %1410  ;;  %v2056_v18 = vadd.f32 %v2051_v46, %v1407_v37  ;;  %1422 = vpow2.f32 %v789_v49  ;;  %893 = vadd.xlane.f32.xlu1 %v892_v57 }
 0x310   : > { %v2058_v13 = vpop.eup %1412 }
 0x311   : > { %v1415_v36 = vpop.eup %1414  ;;  %v2065_v32 = vadd.f32 %v2058_v13, %v1411_v61  ;;  %902 = vadd.xlane.f32.xlu2 %v901_v51 }
 0x312   : > { %v2067_v55 = vpop.eup %1416  ;;  %1045 = vmatpush.bf16.msrb.mxu2 %v1006_v33  ;;  %v898_v33 = vadd.f32 %v1847_v62, %v1843_v44 }
 0x313   : > { %2314 = vst [vmem:[#allocation22_spill] sm:$0xff] %v2065_v32  ;;  %v1419_v63 = vpop.eup %1418  ;;  %v2071_v30 = vadd.f32 %v2067_v55, %v1415_v36  ;;  %v1032_v32 = vpack.c.bf16 %v1403_v20, %v1399_v16  ;;  %v2324_v16 = vld [vmem:[#allocation5_spill] sm:$0xff] }
 0x314   : > { %v1421_v49 = vpop.eup %1420  ;;  %v1036_v47 = vpack.c.bf16 %v1419_v63, %v1415_v36 }
 0x315   : > { %v2077_v48 = vadd.f32 %v1421_v49, %v1419_v63  ;;  %v1423_v57 = vpop.eup %1422  ;;  %1046 = vmatmul.bf16.vlgmr.msrb.gmra.mxu2 %v1004_v52  ;;  %v907_v63 = vadd.f32 %v1867_v3, %v1863_v10  ;;  %v1028_v10 = vpack.c.bf16 %v1991_v42, %v1969_v38  ;;  %v1009_v3 = vpack.c.bf16 %v1799_v39, %v2316_v15  ;;  %v2319_v38 = vld [vmem:[#allocation10_spill] sm:$0xff] }
 0x316   : > { %1064 = vmatpush.bf16.msra.mxu2 %v1021_v11  ;;  %1051 = vmatpush.bf16.msrb.mxu3 %v1036_v47  ;;  %v1034_v11 = vpack.c.bf16 %v1411_v61, %v1407_v37  ;;  %v1017_v36 = vpack.c.bf16 %v1423_v57, %v1855_v1  ;;  %v1015_v47 = vpack.c.bf16 %v1847_v62, %v1839_v56  ;;  %v807_v37 = vmul.f32 1.442695, %v711_v54 }
 0x317   : > { %899 = vadd.xlane.f32.xlu1 %v898_v33  ;;  %v904_v44 = vadd.f32 %v1423_v57, %v1859_v8  ;;  %v1030_v1 = vpack.c.bf16 %v2021_v60, %v2007_v26  ;;  %v913_v56 = vadd.f32 %v1891_v59, %v1877_v25  ;;  %v1011_v62 = vpack.c.bf16 %v1815_v12, %v1807_v4  ;;  %v2317_v12 = vld [vmem:[#allocation46_spill] sm:$0xff]  ;;  %v2318_v59 = vld [vmem:[#allocation47_spill] sm:$0xff]  ;;  %v2323_v60 = vld [vmem:[#allocation4_spill] sm:$0xff] }
 0x318   : > { %1424 = vpow2.f32 %v807_v37  ;;  %v910_v8 = vadd.f32 %v1879_v29, %v1871_v23  ;;  %v1024_v25 = vpack.c.bf16 %v1933_v27, %v1921_v31  ;;  %v1007_v23 = vpack.c.bf16 %v2318_v59, %v2317_v12  ;;  %v147_v29 = vld [vmem:[%s1465_s14 + $0x18] sm:$0xf]  ;;  %v2322_v26 = vld [vmem:[#allocation19_spill] sm:$0xff] }
 0x319   : > { %908 = vadd.xlane.f32.xlu2 %v907_v63  ;;  %v1037_v39 = vpack.c.bf16 %v1421_v49, %v2067_v55  ;;  %v1005_v21 = vpack.c.bf16 %v147_v29, %v147_v29  ;;  %v1035_v31 = vpack.c.bf16 %v2058_v13, %v2051_v46  ;;  %v1031_v27 = vpack.c.bf16 %v2027_v58, %v2015_v7  ;;  %v2325_v7 = vld [vmem:[#allocation2_spill] sm:$0xff] }
 0x31a   : > { %1065 = vmatpush.bf16.msra.mxu2 %v1019_v50  ;;  %1052 = vmatpush.bf16.msrb.mxu3 %v1034_v11  ;;  %v1025_v58 = vpack.c.bf16 %v2324_v16, %v2323_v60 }
 0x31e   : > { %1066 = vmatpush.bf16.msra.mxu2 %v1017_v36  ;;  %1053 = vmatpush.bf16.msrb.mxu3 %v1032_v32  ;;  %v1425_v20 = vpop.eup %1424 }
 0x31f   : > { %905 = vadd.xlane.f32.xlu1 %v904_v44  ;;  %v919_v4 = vadd.f32 %v1425_v20, %v1903_v2  ;;  %v1022_v53 = vpack.c.bf16 %v1909_v34, %v1425_v20  ;;  %v1033_v34 = vpack.c.bf16 %v2042_v45, %v2037_v5 }
 0x321   : > { %914 = vadd.xlane.f32.xlu2 %v913_v56 }
 0x322   : > { %1067 = vmatpush.bf16.msra.mxu2 %v1015_v47  ;;  %1054 = vmatpush.bf16.msrb.mxu3 %v1030_v1 }
 0x326   : > { %1068 = vmatpush.bf16.msra.mxu2 %v1013_v6  ;;  %1055 = vmatpush.bf16.msrb.mxu3 %v1028_v10 }
 0x327   : > { %911 = vadd.xlane.f32.xlu1 %v910_v8 }
 0x329   : > { %920 = vadd.xlane.f32.xlu2 %v919_v4 }
 0x32a   : > { %1069 = vmatpush.bf16.msra.mxu2 %v1011_v62  ;;  %1056 = vmatpush.bf16.msrb.mxu3 %v1026_v35 }
 0x32e   : > { %1070 = vmatpush.bf16.msra.mxu2 %v1009_v3  ;;  %1057 = vmatpush.bf16.msrb.mxu3 %v1024_v25 }
 0x32f   : > { %917 = vadd.xlane.f32.xlu1 %v1967_v14  ;;  %v1029_v14 = vpack.c.bf16 %v2001_v28, %v1977_v19  ;;  %v2328_v19 = vld [vmem:[#allocation18_spill] sm:$0xff] }
 0x330   : > { %v2329_v28 = vld [vmem:[#allocation22_spill] sm:$0xff] }
 0x331   : > { %926 = vadd.xlane.f32.xlu2 %v1975_v22  ;;  %v2320_v22 = vld [vmem:[#allocation13_spill] sm:$0xff] }
 0x332   : > { %1071 = vmatpush.bf16.msra.mxu2 %v1007_v23  ;;  %1058 = vmatpush.bf16.msrb.mxu3 %v1022_v53  ;;  %v1027_v42 = vpack.c.bf16 %v2320_v22, %v2319_v38 }
 0x335   : > { %1072 = vmatmul.bf16.vlgmr.msra.gmra.mxu2 %v1004_v52  ;;  %1059 = vmatmul.bf16.vlgmr.msrb.gmra.mxu3 %v1005_v21 }
 0x336   : > { %1077 = vmatpush.bf16.msra.mxu3 %v1037_v39 }
 0x337   : > { %923 = vadd.xlane.f32.xlu1 %v1981_v43  ;;  %v2321_v43 = vld [vmem:[#allocation15_spill] sm:$0xff] }
 0x339   : > { %932 = vadd.xlane.f32.xlu2 %v1985_v40  ;;  %v2326_v40 = vpack.c.bf16 %v2325_v7, %v1903_v2 }
 0x33a   : > { %1078 = vmatpush.bf16.msra.mxu3 %v1035_v31 }
 0x33e   : > { %1079 = vmatpush.bf16.msra.mxu3 %v1033_v34 }
 0x33f   : > { %929 = vadd.xlane.f32.xlu1 %v1989_v9  ;;  %v2327_v9 = vld [vmem:[#allocation23_spill] sm:$0xff] }
 0x341   : > { %938 = vadd.xlane.f32.xlu2 %v2321_v43 }
 0x342   : > { %1080 = vmatpush.bf16.msra.mxu3 %v1031_v27 }
 0x346   : > { %1081 = vmatpush.bf16.msra.mxu3 %v1029_v14 }
 0x347   : > { %935 = vadd.xlane.f32.xlu1 %v2322_v26 }
 0x349   : > { %944 = vadd.xlane.f32.xlu2 %v2327_v9 }
 0x34a   : > { %1082 = vmatpush.bf16.msra.mxu3 %v1027_v42 }
 0x34e   : > { %1083 = vmatpush.bf16.msra.mxu3 %v1025_v58 }
 0x34f   : > { %941 = vadd.xlane.f32.xlu1 %v2328_v19 }
 0x351   : > { %950 = vadd.xlane.f32.xlu2 %v2040_v41 }
 0x352   : > { %1084 = vmatpush.bf16.msra.mxu3 %v2326_v40 }
 0x355   : > { %1085 = vmatmul.bf16.vlgmr.msra.gmra.mxu3 %v1005_v21 }
 0x357   : > { %947 = vadd.xlane.f32.xlu1 %v2035_v17 }
 0x359   : > { %956 = vadd.xlane.f32.xlu2 %v2056_v18  ;;  %v876_v46 = vpop.xlane.xlu2 %875 }
 0x35a   : > { %v873_v5 = vpop.xlane.xlu1 %872 }
 0x35b   : > { %v967_v63 = vadd.f32 %v876_v46, %v873_v5 }
 0x35f   : > { %953 = vadd.xlane.f32.xlu1 %v2049_v24  ;;  %v1090_v24 = vld [vmem:[%s2160_s1] sm:$0xf] }
 0x361   : > { %962 = vadd.xlane.f32.xlu2 %v2071_v30 }
 0x364   : > { %v879_v47 = vpop.xlane.xlu0 %878 }
 0x365   : > { %v968_v44 = vadd.f32 %v967_v63, %v879_v47 }
 0x367   : > { %959 = vadd.xlane.f32.xlu1 %v2329_v28 }
 0x36a   : > { %v885_v13 = vpop.xlane.xlu2 %884 }
 0x36f   : > { %965 = vadd.xlane.f32.xlu1 %v2077_v48 }
 0x371   : > { %v882_v61 = vpop.xlane.xlu1 %881 }
 0x372   : > { %v891_v30 = vpop.xlane.xlu2 %890  ;;  %v969_v37 = vadd.f32 %v968_v44, %v882_v61 }
 0x374   : > { %v970_v10 = vadd.f32 %v969_v37, %v885_v13 }
 0x37a   : > { %v888_v32 = vpop.xlane.xlu1 %887 }
 0x37b   : > { %v971_v56 = vadd.f32 %v970_v10, %v888_v32 }
 0x37c   : > { %v897_v51 = vpop.xlane.xlu2 %896 }
 0x37d   : > { %v972_v62 = vadd.f32 %v971_v56, %v891_v30 }
 0x382   : > { %v894_v49 = vpop.xlane.xlu1 %893 }
 0x383   : > { %v973_v15 = vadd.f32 %v972_v62, %v894_v49 }
 0x384   : > { %v903_v48 = vpop.xlane.xlu2 %902 }
 0x385   : > { %v974_v3 = vadd.f32 %v973_v15, %v897_v51 }
 0x38a   : > { %v900_v50 = vpop.xlane.xlu1 %899 }
 0x38b   : > { %v975_v20 = vadd.f32 %v974_v3, %v900_v50 }
 0x38c   : > { %v909_v36 = vpop.xlane.xlu2 %908 }
 0x38d   : > { %v976_v12 = vadd.f32 %v975_v20, %v903_v48 }
 0x392   : > { %v906_v57 = vpop.xlane.xlu1 %905 }
 0x393   : > { %v977_v59 = vadd.f32 %v976_v12, %v906_v57 }
 0x394   : > { %v915_v1 = vpop.xlane.xlu2 %914 }
 0x395   : > { %v978_v23 = vadd.f32 %v977_v59, %v909_v36 }
 0x398   : > { %v1047_v2 = vpop.f32.mrf.mxu2 }
 0x39a   : > { %v912_v0 = vpop.xlane.xlu1 %911 }
 0x39b   : > { %v979_v29 = vadd.f32 %v978_v23, %v912_v0 }
 0x39c   : > { %v921_v8 = vpop.xlane.xlu2 %920 }
 0x39d   : > { %v980_v21 = vadd.f32 %v979_v29, %v915_v1 }
 0x3a0   : > { %v1049_v45 = vpop.f32.mrf.mxu2 }
 0x3a2   : > { %v918_v6 = vpop.xlane.xlu1 %917 }
 0x3a3   : > { %v981_v31 = vadd.f32 %v980_v21, %v918_v6 }
 0x3a4   : > { %v927_v25 = vpop.xlane.xlu2 %926 }
 0x3a5   : > { %v982_v34 = vadd.f32 %v981_v31, %v921_v8 }
 0x3aa   : > { %v924_v35 = vpop.xlane.xlu1 %923 }
 0x3ab   : > { %v983_v38 = vadd.f32 %v982_v34, %v924_v35 }
 0x3ac   : > { %v933_v53 = vpop.xlane.xlu2 %932 }
 0x3ad   : > { %v984_v22 = vadd.f32 %v983_v38, %v927_v25 }
 0x3b2   : > { %v930_v4 = vpop.xlane.xlu1 %929 }
 0x3b3   : > { %v985_v42 = vadd.f32 %v984_v22, %v930_v4 }
 0x3b4   : > { %v939_v27 = vpop.xlane.xlu2 %938 }
 0x3b5   : > { %v986_v60 = vadd.f32 %v985_v42, %v933_v53 }
 0x3b8   : > { %v1073_v41 = vpop.f32.mrf.mxu2  ;;  %v1060_v55 = vpop.f32.mrf.mxu3 }
 0x3b9   : > { %v1061_v17 = vadd.f32 %v1060_v55, %v1047_v2 }
 0x3ba   : > { %v936_v39 = vpop.xlane.xlu1 %935 }
 0x3bb   : > { %1279 = vmatpush.msk.msrb.mxu2 %vm315_vm0, %v1061_v17  ;;  %v987_v16 = vadd.f32 %v986_v60, %v936_v39 }
 0x3bc   : > { %1280 = vmatmul.msk.f32.vlgmr.msrb.gmra.mxu2 %vm218_vm1, %v1090_v24  ;;  %v945_v43 = vpop.xlane.xlu2 %944 }
 0x3bd   : > { %v988_v58 = vadd.f32 %v987_v16, %v939_v27 }
 0x3c0   : > { %v1075_v18 = vpop.f32.mrf.mxu2  ;;  %v1062_v52 = vpop.f32.mrf.mxu3 }
 0x3c2   : > { %v942_v14 = vpop.xlane.xlu1 %941 }
 0x3c3   : > { %v989_v7 = vadd.f32 %v988_v58, %v942_v14 }
 0x3c4   : > { %v951_v40 = vpop.xlane.xlu2 %950 }
 0x3c5   : > { %v990_v19 = vadd.f32 %v989_v7, %v945_v43 }
 0x3ca   : > { %v948_v26 = vpop.xlane.xlu1 %947 }
 0x3cb   : > { %v991_v28 = vadd.f32 %v990_v19, %v948_v26 }
 0x3cc   : > { %v957_v5 = vpop.xlane.xlu2 %956 }
 0x3cd   : > { %v992_v2 = vadd.f32 %v991_v28, %v951_v40 }
 0x3d2   : > { %v954_v9 = vpop.xlane.xlu1 %953 }
 0x3d3   : > { %v993_v46 = vadd.f32 %v992_v2, %v954_v9 }
 0x3d4   : > { %v963_v32 = vpop.xlane.xlu2 %962 }
 0x3d5   : > { %v994_v61 = vadd.f32 %v993_v46, %v957_v5 }
 0x3d8   : > { %v1086_v33 = vpop.f32.mrf.mxu3 }
 0x3d9   : > { %v1087_v11 = vadd.f32 %v1086_v33, %v1073_v41 }
 0x3da   : > { %v960_v45 = vpop.xlane.xlu1 %959 }
 0x3db   : > { %1281 = vmatpush.msk.msrb.mxu3 %vm315_vm0, %v1087_v11  ;;  %v995_v13 = vadd.f32 %v994_v61, %v960_v45 }
 0x3dc   : > { %1282 = vmatmul.msk.f32.vlgmr.msrb.gmra.mxu3 %vm218_vm1, %v1090_v24 }
 0x3dd   : > { %v996_v55 = vadd.f32 %v995_v13, %v963_v32 }
 0x3e0   : > { %v1088_v54 = vpop.f32.mrf.mxu3 }
 0x3e2   : > { %v966_v41 = vpop.xlane.xlu1 %965 }
 0x3e3   : > { %v997_v17 = vadd.f32 %v996_v55, %v966_v41 }
 0x3e5   : > { %v998_v24 = vrot.slane %v997_v17, 4 }
 0x3e7   : > { %v999_v18 = vadd.f32 %v998_v24, %v997_v17 }
 0x3e9   : > { %v1000_v30 = vrot.slane %v999_v18, 2 }
 0x3eb   : > { %v1001_v49 = vadd.f32 %v1000_v30, %v999_v18 }
 0x3ed   : > { %v1002_v52 = vrot.slane %v1001_v49, 1 }
 0x3ef   : > { %v1003_v51 = vadd.f32 %v1002_v52, %v1001_v49 }
 0x3f1   : > { %1426 = vrcp.f32 %v1003_v51 }
 0x3f7   : > { %v1427_v50 = vpop.eup %1426 }
 0x43f   : > { %v1117_v48 = vpop.f32.mrf.mxu2 }
 0x440   : > { %v1141_v11 = vmul.f32 %v1427_v50, %v1117_v48 }
 0x45f   : > { %v1137_v57 = vpop.f32.mrf.mxu3 }
 0x460   : > { %v1142_v33 = vmul.f32 %v1427_v50, %v1137_v57 }
 0x462   : > { %v1145_v36 = vrot.slane %v1142_v33, 4 }
 0x464   : > { %v1146_v0 = vsel %vm315_vm0, %v1141_v11, %v1145_v36 }
 0x465   : > { %1148 = vst [vmem:[%s143_s20] sm:$0xff] %v1146_v0 }
 0x466 PF: > { %s12_s9 = sadd.s32 1, %s1434_s9  }
 0x467   : > { %p9_p4 = scmp.ge.s32.totalorder %s12_s9, 4  }
 0x469   :  { %11 = sbr.rel (!%p9_p4) target bundleno = 1 (0x1), region = 58 }

</bundles_post_ra>
